<compile_context>
chip_gen: v5e
topology: v5e:2x2
jax: 0.10.0
libtpu: 0.0.40
codegen_flags: <defaults>
</compile_context>

<pallas_src>
import jax
import jax.numpy as jnp
from jax import lax
from jax.experimental import pallas as pl
from jax.experimental.pallas import tpu as pltpu


_LRELU = 0.2
_BN_EPS = 1e-5
_VMEM_LIMIT = 32 * 1024 * 1024  # <= physical VMEM on v5e/v6e/v7x
_IMG_BLOCK = 8                  # images per grid step (when batch >= 8)


def _leaky(x):
    return jnp.where(x > 0, x, _LRELU * x)


# ----------------------------------------------------------------------------
# Kernel 1: conv1 + LeakyReLU + in-VMEM im2col + conv2 (pre-BN) + BN partials
# ----------------------------------------------------------------------------
def _conv_stack_kernel(p_ref, w1_ref, w2_ref, y2_ref, stats_ref):
    # p_ref  : (IB, 64, 64)  conv1 patches, padded space-to-depth layout
    #          row = a*8+b (coarse spatial), col = (r*2+s)*16 + (kh*4+kw)
    # w1_ref : (64, 128)     block-diagonal conv1 weight (4 copies of (16,32))
    # w2_ref : (4, 128, 64)  conv2 weight regrouped by (di, dj) taps
    # y2_ref : (IB, 7, 7, 64) pre-BatchNorm conv2 output (NHWC)
    # stats  : (1, 2, 64)    per-block per-channel [sum, sum of squares]
    ib = y2_ref.shape[0]

    # conv1: ONE lane-dense MXU matmul for the whole image block.
    p = p_ref[...].reshape(ib * 64, 64)
    y1 = jnp.dot(p, w1_ref[...], preferred_element_type=jnp.float32)
    y1 = _leaky(y1)                                            # (IB*64, 128)

    # conv2 (k=4, s=2, p=1) decomposed over the 4 coarse taps (di, dj):
    #   out[img,oh,ow,:] += Y[img, oh+di, ow+dj, :] @ W2sd[di*2+dj]
    acc = None
    for di in range(2):
        for dj in range(2):
            plane = jnp.dot(y1, w2_ref[2 * di + dj],
                            preferred_element_type=jnp.float32)  # (IB*64, 64)
            plane = plane.reshape(ib, 8, 8, 64)
            part = plane[:, di:di + 7, dj:dj + 7, :]             # (IB, 7, 7, 64)
            acc = part if acc is None else acc + part

    y2_ref[...] = acc                                            # (IB, 7, 7, 64)

    # Per-block BatchNorm partial statistics (f32).  Reductions stay on the
    # sublane axes; channel (lane) axis is preserved.
    s0 = jnp.sum(acc, axis=0)                                    # (7, 7, 64)
    s1 = jnp.sum(s0, axis=0)                                     # (7, 64)
    stats_ref[0, 0:1, :] = jnp.sum(s1, axis=0, keepdims=True)    # (1, 64)
    q0 = jnp.sum(acc * acc, axis=0)
    q1 = jnp.sum(q0, axis=0)
    stats_ref[0, 1:2, :] = jnp.sum(q1, axis=0, keepdims=True)


def _conv_stack(p_sd, w1_blk, w2_sd, ib):
    n_pad = p_sd.shape[0]
    nb = n_pad // ib
    return pl.pallas_call(
        _conv_stack_kernel,
        grid=(nb,),
        in_specs=[
            pl.BlockSpec((ib, 64, 64), lambda i: (i, 0, 0)),
            pl.BlockSpec((64, 128), lambda i: (0, 0)),
            pl.BlockSpec((4, 128, 64), lambda i: (0, 0, 0)),
        ],
        out_specs=(
            pl.BlockSpec((ib, 7, 7, 64), lambda i: (i, 0, 0, 0)),
            pl.BlockSpec((1, 2, 64), lambda i: (i, 0, 0)),
        ),
        out_shape=(
            jax.ShapeDtypeStruct((n_pad, 7, 7, 64), jnp.float32),
            jax.ShapeDtypeStruct((nb, 2, 64), jnp.float32),
        ),
        compiler_params=pltpu.CompilerParams(
            dimension_semantics=("parallel",),
            vmem_limit_bytes=_VMEM_LIMIT,
        ),
    )(p_sd, w1_blk, w2_sd)


# ----------------------------------------------------------------------------
# Kernel 2: BatchNorm (folded scale/shift) + LeakyReLU + Linear(3136->1)+Sigmoid
# ----------------------------------------------------------------------------
def _bn_classifier_kernel(y2_ref, scale_ref, shift_ref, fcw_ref, fcb_ref, o_ref):
    # y2_ref : (IB, 7, 7, 64);  scale/shift: (1, 64);  fcw: (7, 7, 64) (h,w,c)
    # fcb_ref: (1, 1) scalar in SMEM;  o_ref: (IB, 1)
    y = y2_ref[...] * scale_ref[...] + shift_ref[...]       # BatchNorm affine
    y = _leaky(y)

    prod = y * fcw_ref[...]                                  # fused classifier
    t = jnp.sum(prod, axis=1)                                # (IB, 7, 64)
    t = jnp.sum(t, axis=1)                                   # (IB, 64)
    z = jnp.sum(t, axis=1, keepdims=True)                    # (IB, 1)
    z = z + fcb_ref[0, 0]

    # sigmoid = exp (EUP) + approximate reciprocal (EUP) — no VALU divide.
    o_ref[...] = pl.reciprocal(1.0 + jnp.exp(-z), approx=True)


def _bn_classifier(y2, scale, shift, fcw_hwc, fcb, ib):
    n_pad = y2.shape[0]
    nb = n_pad // ib
    return pl.pallas_call(
        _bn_classifier_kernel,
        grid=(nb,),
        in_specs=[
            pl.BlockSpec((ib, 7, 7, 64), lambda i: (i, 0, 0, 0)),
            pl.BlockSpec((1, 64), lambda i: (0, 0)),
            pl.BlockSpec((1, 64), lambda i: (0, 0)),
            pl.BlockSpec((7, 7, 64), lambda i: (0, 0, 0)),
            pl.BlockSpec(memory_space=pltpu.MemorySpace.SMEM),
        ],
        out_specs=pl.BlockSpec((ib, 1), lambda i: (i, 0)),
        out_shape=jax.ShapeDtypeStruct((n_pad, 1), jnp.float32),
        compiler_params=pltpu.CompilerParams(
            dimension_semantics=("parallel",),
            vmem_limit_bytes=_VMEM_LIMIT,
        ),
    )(y2, scale, shift, fcw_hwc, fcb)


# ----------------------------------------------------------------------------
# Host-side (cheap, one-time per call) layout prep
# ----------------------------------------------------------------------------
def _prep_conv1_patches(x_nchw):
    """(N,1,28,28) -> (N,64,64) padded space-to-depth conv1 patch matrix."""
    n = x_nchw.shape[0]
    x = jnp.transpose(x_nchw, (0, 2, 3, 1))[..., 0]          # (N, 28, 28)
    xp = jnp.pad(x, ((0, 0), (1, 1), (1, 1)))                # (N, 30, 30)
    cols = []
    for kh in range(4):
        for kw in range(4):
            cols.append(xp[:, kh:kh + 28:2, kw:kw + 28:2])   # (N, 14, 14)
    p = jnp.stack(cols, axis=-1)                             # (N,14,14,16) k=kh*4+kw
    p = jnp.pad(p, ((0, 0), (1, 1), (1, 1), (0, 0)))         # pad=1 of conv2 input
    p = p.reshape(n, 8, 2, 8, 2, 16)                         # (n, a, r, b, s, k)
    p = jnp.transpose(p, (0, 1, 3, 2, 4, 5))                 # (n, a, b, r, s, k)
    return p.reshape(n, 64, 64)


def _prep_weights(params):
    # conv1 (32,1,4,4) -> block-diagonal (64,128): 4 copies of (16,32)
    w1mat = jnp.transpose(params["conv1_w"], (2, 3, 1, 0)).reshape(16, 32)
    w1_blk = jnp.kron(jnp.eye(4, dtype=w1mat.dtype), w1mat)          # (64, 128)

    # conv2 (64,32,4,4) -> (4,128,64): [di*2+dj, (r*2+s)*32+c, oc]
    wt = jnp.transpose(params["conv2_w"], (2, 3, 1, 0))              # (kh,kw,ic,oc)
    wt = wt.reshape(2, 2, 2, 2, 32, 64)                              # (di,r,dj,s,c,oc)
    wt = jnp.transpose(wt, (0, 2, 1, 3, 4, 5))                       # (di,dj,r,s,c,oc)
    w2_sd = wt.reshape(4, 128, 64)

    # fc weight (1,3136) over (c,h,w) flatten -> (7,7,64) in (h,w,c) order
    fcw_hwc = params["fc_w"].reshape(64, 7, 7).transpose(1, 2, 0)
    fcb = params["fc_b"].reshape(1, 1).astype(jnp.float32)
    return w1_blk, w2_sd, fcw_hwc, fcb


def init_params(key):
    k1, k2, k3 = jax.random.split(key, 3)
    return {
        "conv1_w": 0.02 * jax.random.normal(k1, (32, 1, 4, 4), jnp.float32),
        "conv2_w": 0.02 * jax.random.normal(k2, (64, 32, 4, 4), jnp.float32),
        "bn_gamma": jnp.ones((64,), jnp.float32),
        "bn_beta": jnp.zeros((64,), jnp.float32),
        "fc_w": 0.02 * jax.random.normal(k3, (1, 7 * 7 * 64), jnp.float32),
        "fc_b": jnp.zeros((1,), jnp.float32),
    }


def discriminator_forward(params, x_nchw):
    """x_nchw: (N, 1, 28, 28) float32 -> (N, 1) float32 in (0, 1)."""
    n = x_nchw.shape[0]
    ib = _IMG_BLOCK if n >= _IMG_BLOCK else n
    n_pad = ((n + ib - 1) // ib) * ib

    p_sd = _prep_conv1_patches(x_nchw.astype(jnp.float32))
    if n_pad > n:
        # Padded (all-zero) images contribute exactly 0 to BN sums (no biases).
        p_sd = jnp.pad(p_sd, ((0, n_pad - n), (0, 0), (0, 0)))
    w1_blk, w2_sd, fcw_hwc, fcb = _prep_weights(params)

    # Phase 1: fused conv stack + per-block BN partial sums.
    y2, stats = _conv_stack(p_sd, w1_blk, w2_sd, ib)

    # Tiny host reduce: batch (biased) statistics, folded into scale/shift.
    total = jnp.sum(stats, axis=0)                                    # (2, 64)
    count = jnp.float32(n * 49)
    mean = total[0] / count                                           # (64,)
    ex2 = total[1] / count
    var = ex2 - mean * mean                                           # biased (train mode)
    inv = lax.rsqrt(var + _BN_EPS)
    scale = (params["bn_gamma"] * inv).reshape(1, 64)
    shift = (params["bn_beta"] - mean * params["bn_gamma"] * inv).reshape(1, 64)

    # Phase 2: normalize + LeakyReLU + classifier + sigmoid.
    out = _bn_classifier(y2, scale, shift, fcw_hwc, fcb, ib)
    return out[:n]


# ----------------------------------------------------------------------------
# Pure-JAX reference (matches the PyTorch module in training mode)
# ----------------------------------------------------------------------------
def _reference_forward(params, x_nchw):
    y1 = lax.conv_general_dilated(
        x_nchw, params["conv1_w"], window_strides=(2, 2),
        padding=((1, 1), (1, 1)), dimension_numbers=("NCHW", "OIHW", "NCHW"))
    y1 = _leaky(y1)
    y2 = lax.conv_general_dilated(
        y1, params["conv2_w"], window_strides=(2, 2),
        padding=((1, 1), (1, 1)), dimension_numbers=("NCHW", "OIHW", "NCHW"))
    mean = jnp.mean(y2, axis=(0, 2, 3), keepdims=True)
    var = jnp.mean((y2 - mean) ** 2, axis=(0, 2, 3), keepdims=True)
    y2 = (y2 - mean) * lax.rsqrt(var + _BN_EPS)
    y2 = y2 * params["bn_gamma"].reshape(1, 64, 1, 1) + params["bn_beta"].reshape(1, 64, 1, 1)
    y2 = _leaky(y2)
    flat = y2.reshape(y2.shape[0], -1)
    z = flat @ params["fc_w"].T + params["fc_b"]
    return jax.nn.sigmoid(z)


if __name__ == "__main__":
    key = jax.random.PRNGKey(0)
    pkey, xkey = jax.random.split(key)
    params = init_params(pkey)
    # Spatial size is fixed at 28x28 by the 7*7*64 classifier; small batch = 2.
    x = jax.random.normal(xkey, (2, 1, 28, 28), jnp.float32)

    fwd = jax.jit(discriminator_forward)
    out = jax.block_until_ready(fwd(params, x))
    ref = jax.block_until_ready(_reference_forward(params, x))

    assert out.shape == (2, 1) and out.dtype == jnp.float32
    assert bool(jnp.all(jnp.isfinite(out)))
    assert bool(jnp.all((out >= 0.0) & (out <= 1.0)))
    assert bool(jnp.allclose(out, ref, rtol=0.0, atol=5e-3)), (out, ref)
    print("KERNEL_OK")
</pallas_src>

<mosaic_0001>
module attributes {stable_mosaic.version = 11 : i64} {
  func.func @_conv_stack_kernel(%arg0: i32, %arg1: memref<2x64x64xf32, #tpu.memory_space<vmem>>, %arg2: memref<64x128xf32, #tpu.memory_space<vmem>>, %arg3: memref<4x128x64xf32, #tpu.memory_space<vmem>>, %arg4: memref<2x7x7x64xf32, #tpu.memory_space<vmem>>, %arg5: memref<1x2x64xf32, #tpu.memory_space<vmem>>) attributes {dimension_semantics = [#tpu.dimension_semantics<parallel>], iteration_bounds = array<i64: 1>, scalar_prefetch = 0 : i64, scratch_operands = 0 : i64, tpu.core_type = #tpu.core_type<tc>, window_params = [{transform_indices = @transform_0, window_bounds = array<i64: 2, 64, 64>}, {pipeline_mode = #tpu.pipeline_mode<synchronous>, transform_indices = @transform_1, window_bounds = array<i64: 64, 128>}, {pipeline_mode = #tpu.pipeline_mode<synchronous>, transform_indices = @transform_2, window_bounds = array<i64: 4, 128, 64>}, {transform_indices = @transform_3, window_bounds = array<i64: 2, 7, 7, 64>}, {transform_indices = @transform_4, window_bounds = array<i64: 1, 2, 64>}]} {
    %c0 = arith.constant 0 : index
    %c0_0 = arith.constant 0 : index
    %c0_1 = arith.constant 0 : index
    %0 = vector.load %arg1[%c0, %c0_0, %c0_1] : memref<2x64x64xf32, #tpu.memory_space<vmem>>, vector<2x64x64xf32>
    %1 = vector.shape_cast %0 : vector<2x64x64xf32> to vector<128x64xf32>
    %c0_2 = arith.constant 0 : index
    %c0_3 = arith.constant 0 : index
    %2 = vector.load %arg2[%c0_2, %c0_3] : memref<64x128xf32, #tpu.memory_space<vmem>>, vector<64x128xf32>
    %cst = arith.constant dense<0.000000e+00> : vector<128x128xf32>
    %3 = tpu.matmul %1, %2, %cst {dimension_numbers = #tpu.dot_dimension_numbers<[1], [0], [0], [1], [0, 0, 1, 1], [], []>} : vector<128x64xf32>, vector<64x128xf32>, vector<128x128xf32> -> vector<128x128xf32>
    %cst_4 = arith.constant 0.000000e+00 : f32
    %4 = vector.broadcast %cst_4 : f32 to vector<128x128xf32>
    %5 = arith.cmpf ogt, %3, %4 : vector<128x128xf32>
    %cst_5 = arith.constant 2.000000e-01 : f32
    %6 = vector.broadcast %cst_5 : f32 to vector<128x128xf32>
    %7 = arith.mulf %6, %3 : vector<128x128xf32>
    %8 = arith.select %5, %3, %7 : vector<128x128xi1>, vector<128x128xf32>
    %c0_6 = arith.constant 0 : index
    %c0_7 = arith.constant 0 : index
    %c0_8 = arith.constant 0 : index
    %9 = vector.load %arg3[%c0_6, %c0_7, %c0_8] : memref<4x128x64xf32, #tpu.memory_space<vmem>>, vector<1x128x64xf32>
    %10 = vector.shape_cast %9 : vector<1x128x64xf32> to vector<128x64xf32>
    %cst_9 = arith.constant dense<0.000000e+00> : vector<128x64xf32>
    %11 = tpu.matmul %8, %10, %cst_9 {dimension_numbers = #tpu.dot_dimension_numbers<[1], [0], [0], [1], [0, 0, 1, 1], [], []>} : vector<128x128xf32>, vector<128x64xf32>, vector<128x64xf32> -> vector<128x64xf32>
    %12 = vector.shape_cast %11 : vector<128x64xf32> to vector<2x8x8x64xf32>
    %13 = vector.extract_strided_slice %12 {offsets = [0, 0, 0, 0], sizes = [2, 7, 7, 64], strides = [1, 1, 1, 1]} : vector<2x8x8x64xf32> to vector<2x7x7x64xf32>
    %c1 = arith.constant 1 : index
    %c0_10 = arith.constant 0 : index
    %c0_11 = arith.constant 0 : index
    %14 = vector.load %arg3[%c1, %c0_10, %c0_11] : memref<4x128x64xf32, #tpu.memory_space<vmem>>, vector<1x128x64xf32>
    %15 = vector.shape_cast %14 : vector<1x128x64xf32> to vector<128x64xf32>
    %cst_12 = arith.constant dense<0.000000e+00> : vector<128x64xf32>
    %16 = tpu.matmul %8, %15, %cst_12 {dimension_numbers = #tpu.dot_dimension_numbers<[1], [0], [0], [1], [0, 0, 1, 1], [], []>} : vector<128x128xf32>, vector<128x64xf32>, vector<128x64xf32> -> vector<128x64xf32>
    %17 = vector.shape_cast %16 : vector<128x64xf32> to vector<2x8x8x64xf32>
    %18 = vector.extract_strided_slice %17 {offsets = [0, 0, 1, 0], sizes = [2, 7, 7, 64], strides = [1, 1, 1, 1]} : vector<2x8x8x64xf32> to vector<2x7x7x64xf32>
    %19 = arith.addf %13, %18 : vector<2x7x7x64xf32>
    %c2 = arith.constant 2 : index
    %c0_13 = arith.constant 0 : index
    %c0_14 = arith.constant 0 : index
    %20 = vector.load %arg3[%c2, %c0_13, %c0_14] : memref<4x128x64xf32, #tpu.memory_space<vmem>>, vector<1x128x64xf32>
    %21 = vector.shape_cast %20 : vector<1x128x64xf32> to vector<128x64xf32>
    %cst_15 = arith.constant dense<0.000000e+00> : vector<128x64xf32>
    %22 = tpu.matmul %8, %21, %cst_15 {dimension_numbers = #tpu.dot_dimension_numbers<[1], [0], [0], [1], [0, 0, 1, 1], [], []>} : vector<128x128xf32>, vector<128x64xf32>, vector<128x64xf32> -> vector<128x64xf32>
    %23 = vector.shape_cast %22 : vector<128x64xf32> to vector<2x8x8x64xf32>
    %24 = vector.extract_strided_slice %23 {offsets = [0, 1, 0, 0], sizes = [2, 7, 7, 64], strides = [1, 1, 1, 1]} : vector<2x8x8x64xf32> to vector<2x7x7x64xf32>
    %25 = arith.addf %19, %24 : vector<2x7x7x64xf32>
    %c3 = arith.constant 3 : index
    %c0_16 = arith.constant 0 : index
    %c0_17 = arith.constant 0 : index
    %26 = vector.load %arg3[%c3, %c0_16, %c0_17] : memref<4x128x64xf32, #tpu.memory_space<vmem>>, vector<1x128x64xf32>
    %27 = vector.shape_cast %26 : vector<1x128x64xf32> to vector<128x64xf32>
    %cst_18 = arith.constant dense<0.000000e+00> : vector<128x64xf32>
    %28 = tpu.matmul %8, %27, %cst_18 {dimension_numbers = #tpu.dot_dimension_numbers<[1], [0], [0], [1], [0, 0, 1, 1], [], []>} : vector<128x128xf32>, vector<128x64xf32>, vector<128x64xf32> -> vector<128x64xf32>
    %29 = vector.shape_cast %28 : vector<128x64xf32> to vector<2x8x8x64xf32>
    %30 = vector.extract_strided_slice %29 {offsets = [0, 1, 1, 0], sizes = [2, 7, 7, 64], strides = [1, 1, 1, 1]} : vector<2x8x8x64xf32> to vector<2x7x7x64xf32>
    %31 = arith.addf %25, %30 : vector<2x7x7x64xf32>
    %c0_19 = arith.constant 0 : index
    %c0_20 = arith.constant 0 : index
    %c0_21 = arith.constant 0 : index
    %c0_22 = arith.constant 0 : index
    %32 = vector.load %arg4[%c0_19, %c0_20, %c0_21, %c0_22] : memref<2x7x7x64xf32, #tpu.memory_space<vmem>>, vector<2x7x7x64xf32>
    tpu.vector_store %arg4[%c0_19, %c0_20, %c0_21, %c0_22], %31 {strides = array<i32>} : memref<2x7x7x64xf32, #tpu.memory_space<vmem>>, vector<2x7x7x64xf32>,
    %cst_23 = arith.constant dense<0.000000e+00> : vector<7x7x64xf32>
    %33 = vector.multi_reduction <add>, %31, %cst_23 [0] : vector<2x7x7x64xf32> to vector<7x7x64xf32>
    %cst_24 = arith.constant dense<0.000000e+00> : vector<7x64xf32>
    %34 = vector.multi_reduction <add>, %33, %cst_24 [0] : vector<7x7x64xf32> to vector<7x64xf32>
    %cst_25 = arith.constant dense<0.000000e+00> : vector<64xf32>
    %35 = vector.multi_reduction <add>, %34, %cst_25 [0] : vector<7x64xf32> to vector<64xf32>
    %36 = vector.shape_cast %35 : vector<64xf32> to vector<1x64xf32>
    %c0_26 = arith.constant 0 : index
    %c0_27 = arith.constant 0 : index
    %c0_28 = arith.constant 0 : index
    %37 = vector.load %arg5[%c0_26, %c0_27, %c0_28] : memref<1x2x64xf32, #tpu.memory_space<vmem>>, vector<1x1x64xf32>
    %38 = vector.shape_cast %37 : vector<1x1x64xf32> to vector<1x64xf32>
    %39 = vector.shape_cast %36 : vector<1x64xf32> to vector<1x1x64xf32>
    tpu.vector_store %arg5[%c0_26, %c0_27, %c0_28], %39 {strides = array<i32>} : memref<1x2x64xf32, #tpu.memory_space<vmem>>, vector<1x1x64xf32>,
    %40 = arith.mulf %31, %31 : vector<2x7x7x64xf32>
    %cst_29 = arith.constant dense<0.000000e+00> : vector<7x7x64xf32>
    %41 = vector.multi_reduction <add>, %40, %cst_29 [0] : vector<2x7x7x64xf32> to vector<7x7x64xf32>
    %cst_30 = arith.constant dense<0.000000e+00> : vector<7x64xf32>
    %42 = vector.multi_reduction <add>, %41, %cst_30 [0] : vector<7x7x64xf32> to vector<7x64xf32>
    %cst_31 = arith.constant dense<0.000000e+00> : vector<64xf32>
    %43 = vector.multi_reduction <add>, %42, %cst_31 [0] : vector<7x64xf32> to vector<64xf32>
    %44 = vector.shape_cast %43 : vector<64xf32> to vector<1x64xf32>
    %c0_32 = arith.constant 0 : index
    %c1_33 = arith.constant 1 : index
    %c0_34 = arith.constant 0 : index
    %45 = vector.load %arg5[%c0_32, %c1_33, %c0_34] : memref<1x2x64xf32, #tpu.memory_space<vmem>>, vector<1x1x64xf32>
    %46 = vector.shape_cast %45 : vector<1x1x64xf32> to vector<1x64xf32>
    %47 = vector.shape_cast %44 : vector<1x64xf32> to vector<1x1x64xf32>
    tpu.vector_store %arg5[%c0_32, %c1_33, %c0_34], %47 {strides = array<i32>} : memref<1x2x64xf32, #tpu.memory_space<vmem>>, vector<1x1x64xf32>,
    return
  }
  func.func @transform_0(%arg0: i32) -> (i32, i32, i32) {
    %c0_i32 = arith.constant 0 : i32
    %c0_i32_0 = arith.constant 0 : i32
    %c0_i32_1 = arith.constant 0 : i32
    return %arg0, %c0_i32, %c0_i32_0 : i32, i32, i32
  }
  func.func @transform_1(%arg0: i32) -> (i32, i32) {
    %c0_i32 = arith.constant 0 : i32
    %c0_i32_0 = arith.constant 0 : i32
    %c0_i32_1 = arith.constant 0 : i32
    return %c0_i32, %c0_i32_0 : i32, i32
  }
  func.func @transform_2(%arg0: i32) -> (i32, i32, i32) {
    %c0_i32 = arith.constant 0 : i32
    %c0_i32_0 = arith.constant 0 : i32
    %c0_i32_1 = arith.constant 0 : i32
    %c0_i32_2 = arith.constant 0 : i32
    return %c0_i32, %c0_i32_0, %c0_i32_1 : i32, i32, i32
  }
  func.func @transform_3(%arg0: i32) -> (i32, i32, i32, i32) {
    %c0_i32 = arith.constant 0 : i32
    %c0_i32_0 = arith.constant 0 : i32
    %c0_i32_1 = arith.constant 0 : i32
    %c0_i32_2 = arith.constant 0 : i32
    return %arg0, %c0_i32, %c0_i32_0, %c0_i32_1 : i32, i32, i32, i32
  }
  func.func @transform_4(%arg0: i32) -> (i32, i32, i32) {
    %c0_i32 = arith.constant 0 : i32
    %c0_i32_0 = arith.constant 0 : i32
    %c0_i32_1 = arith.constant 0 : i32
    return %arg0, %c0_i32, %c0_i32_0 : i32, i32, i32
  }
}

module attributes {stable_mosaic.version = 11 : i64} {
  func.func @_bn_classifier_kernel(%arg0: i32, %arg1: memref<2x7x7x64xf32, #tpu.memory_space<vmem>>, %arg2: memref<1x64xf32, #tpu.memory_space<vmem>>, %arg3: memref<1x64xf32, #tpu.memory_space<vmem>>, %arg4: memref<7x7x64xf32, #tpu.memory_space<vmem>>, %arg5: memref<1x1xf32, #tpu.memory_space<smem>>, %arg6: memref<2x1xf32, #tpu.memory_space<vmem>>) attributes {dimension_semantics = [#tpu.dimension_semantics<parallel>], iteration_bounds = array<i64: 1>, scalar_prefetch = 0 : i64, scratch_operands = 0 : i64, tpu.core_type = #tpu.core_type<tc>, window_params = [{transform_indices = @transform_0, window_bounds = array<i64: 2, 7, 7, 64>}, {pipeline_mode = #tpu.pipeline_mode<synchronous>, transform_indices = @transform_1, window_bounds = array<i64: 1, 64>}, {pipeline_mode = #tpu.pipeline_mode<synchronous>, transform_indices = @transform_2, window_bounds = array<i64: 1, 64>}, {pipeline_mode = #tpu.pipeline_mode<synchronous>, transform_indices = @transform_3, window_bounds = array<i64: 7, 7, 64>}, {transform_indices = @transform_4, window_bounds = array<i64: 1, 1>}, {transform_indices = @transform_5, window_bounds = array<i64: 2, 1>}]} {
    %c0 = arith.constant 0 : index
    %c0_0 = arith.constant 0 : index
    %c0_1 = arith.constant 0 : index
    %c0_2 = arith.constant 0 : index
    %0 = vector.load %arg1[%c0, %c0_0, %c0_1, %c0_2] : memref<2x7x7x64xf32, #tpu.memory_space<vmem>>, vector<2x7x7x64xf32>
    %c0_3 = arith.constant 0 : index
    %c0_4 = arith.constant 0 : index
    %1 = vector.load %arg2[%c0_3, %c0_4] : memref<1x64xf32, #tpu.memory_space<vmem>>, vector<1x64xf32>
    %2 = vector.shape_cast %1 : vector<1x64xf32> to vector<1x1x1x64xf32>
    %3 = vector.broadcast %2 : vector<1x1x1x64xf32> to vector<2x7x7x64xf32>
    %4 = arith.mulf %0, %3 : vector<2x7x7x64xf32>
    %c0_5 = arith.constant 0 : index
    %c0_6 = arith.constant 0 : index
    %5 = vector.load %arg3[%c0_5, %c0_6] : memref<1x64xf32, #tpu.memory_space<vmem>>, vector<1x64xf32>
    %6 = vector.shape_cast %5 : vector<1x64xf32> to vector<1x1x1x64xf32>
    %7 = vector.broadcast %6 : vector<1x1x1x64xf32> to vector<2x7x7x64xf32>
    %8 = arith.addf %4, %7 : vector<2x7x7x64xf32>
    %cst = arith.constant 0.000000e+00 : f32
    %9 = vector.broadcast %cst : f32 to vector<2x7x7x64xf32>
    %10 = arith.cmpf ogt, %8, %9 : vector<2x7x7x64xf32>
    %cst_7 = arith.constant 2.000000e-01 : f32
    %11 = vector.broadcast %cst_7 : f32 to vector<2x7x7x64xf32>
    %12 = arith.mulf %11, %8 : vector<2x7x7x64xf32>
    %13 = arith.select %10, %8, %12 : vector<2x7x7x64xi1>, vector<2x7x7x64xf32>
    %c0_8 = arith.constant 0 : index
    %c0_9 = arith.constant 0 : index
    %c0_10 = arith.constant 0 : index
    %14 = vector.load %arg4[%c0_8, %c0_9, %c0_10] : memref<7x7x64xf32, #tpu.memory_space<vmem>>, vector<7x7x64xf32>
    %15 = vector.shape_cast %14 : vector<7x7x64xf32> to vector<1x7x7x64xf32>
    %16 = vector.broadcast %15 : vector<1x7x7x64xf32> to vector<2x7x7x64xf32>
    %17 = arith.mulf %13, %16 : vector<2x7x7x64xf32>
    %cst_11 = arith.constant dense<0.000000e+00> : vector<2x7x64xf32>
    %18 = vector.multi_reduction <add>, %17, %cst_11 [1] : vector<2x7x7x64xf32> to vector<2x7x64xf32>
    %cst_12 = arith.constant dense<0.000000e+00> : vector<2x64xf32>
    %19 = vector.multi_reduction <add>, %18, %cst_12 [1] : vector<2x7x64xf32> to vector<2x64xf32>
    %cst_13 = arith.constant dense<0.000000e+00> : vector<2xf32>
    %20 = vector.multi_reduction <add>, %19, %cst_13 [1] : vector<2x64xf32> to vector<2xf32>
    %21 = vector.shape_cast %20 : vector<2xf32> to vector<2x1xf32>
    %c0_14 = arith.constant 0 : index
    %c0_15 = arith.constant 0 : index
    %22 = memref.load %arg5[%c0_14, %c0_15] : memref<1x1xf32, #tpu.memory_space<smem>>
    %23 = vector.broadcast %22 : f32 to vector<2x1xf32>
    %24 = arith.addf %21, %23 : vector<2x1xf32>
    %cst_16 = arith.constant 0.000000e+00 : f32
    %25 = vector.broadcast %cst_16 : f32 to vector<2x1xf32>
    %26 = arith.subf %25, %24 : vector<2x1xf32>
    %27 = math.exp %26 : vector<2x1xf32>
    %cst_17 = arith.constant 1.000000e+00 : f32
    %28 = vector.broadcast %cst_17 : f32 to vector<2x1xf32>
    %29 = arith.addf %28, %27 : vector<2x1xf32>
    %30 = tpu.reciprocal %29 {approx = true} : vector<2x1xf32> -> vector<2x1xf32>
    %c0_18 = arith.constant 0 : index
    %c0_19 = arith.constant 0 : index
    %31 = vector.load %arg6[%c0_18, %c0_19] : memref<2x1xf32, #tpu.memory_space<vmem>>, vector<2x1xf32>
    tpu.vector_store %arg6[%c0_18, %c0_19], %30 {strides = array<i32>} : memref<2x1xf32, #tpu.memory_space<vmem>>, vector<2x1xf32>,
    return
  }
  func.func @transform_0(%arg0: i32) -> (i32, i32, i32, i32) {
    %c0_i32 = arith.constant 0 : i32
    %c0_i32_0 = arith.constant 0 : i32
    %c0_i32_1 = arith.constant 0 : i32
    %c0_i32_2 = arith.constant 0 : i32
    return %arg0, %c0_i32, %c0_i32_0, %c0_i32_1 : i32, i32, i32, i32
  }
  func.func @transform_1(%arg0: i32) -> (i32, i32) {
    %c0_i32 = arith.constant 0 : i32
    %c0_i32_0 = arith.constant 0 : i32
    %c0_i32_1 = arith.constant 0 : i32
    return %c0_i32, %c0_i32_0 : i32, i32
  }
  func.func @transform_2(%arg0: i32) -> (i32, i32) {
    %c0_i32 = arith.constant 0 : i32
    %c0_i32_0 = arith.constant 0 : i32
    %c0_i32_1 = arith.constant 0 : i32
    return %c0_i32, %c0_i32_0 : i32, i32
  }
  func.func @transform_3(%arg0: i32) -> (i32, i32, i32) {
    %c0_i32 = arith.constant 0 : i32
    %c0_i32_0 = arith.constant 0 : i32
    %c0_i32_1 = arith.constant 0 : i32
    %c0_i32_2 = arith.constant 0 : i32
    return %c0_i32, %c0_i32_0, %c0_i32_1 : i32, i32, i32
  }
  func.func @transform_4(%arg0: i32) -> (i32, i32) {
    %c0_i32 = arith.constant 0 : i32
    %c0_i32_0 = arith.constant 0 : i32
    %c0_i32_1 = arith.constant 0 : i32
    return %c0_i32, %c0_i32_0 : i32, i32
  }
  func.func @transform_5(%arg0: i32) -> (i32, i32) {
    %c0_i32 = arith.constant 0 : i32
    %c0_i32_0 = arith.constant 0 : i32
    return %arg0, %c0_i32 : i32, i32
  }
}

</mosaic_0001>

<bundles_post_ra>
// kernel: discriminator_forward.3
= control target key start
LH: loop header
LB: loop body
LE: loop exit
PB: predicated region body
PF: predicated region fallthrough
CT: control target
= control target key end

     0   :  { %vm134_vm8 = vcmask 522240   ;;  %vm177_vm15 = vcmask 1041409   ;;  %s351_s0 = inlined_call_operand.vmem [shape: f32[2,7,7,64], index: 0, kind: input, shape index: {}]   ;;  %s352_s1 = inlined_call_operand.vmem [shape: f32[1,64], index: 1, kind: input, shape index: {}]   ;;  %s353_s2 = inlined_call_operand.vmem [shape: f32[1,64], index: 2, kind: input, shape index: {}]   ;;  %s354_s3 = inlined_call_operand.vmem [shape: f32[7,7,64], index: 3, kind: input, shape index: {}]   ;;  %s355_s4 = inlined_call_operand.<no memory space> [shape: f32[1,1], index: 4, kind: input, shape index: {}]   ;;  %s356_s5 = inlined_call_operand.vmem [shape: f32[2,1], index: 5, kind: output, shape index: {}]  }
   0x1   :  { %v21_v0 = vld [vmem:[%s351_s0] sm:$0x7f]  ;;  %v22_v1 = vld [vmem:[%s351_s0 + $0x8] sm:$0x7f]  ;;  %v23_v2 = vld [vmem:[%s351_s0 + $0x10] sm:$0x7f] }
   0x2   :  { %v24_v3 = vld [vmem:[%s351_s0 + $0x18] sm:$0x7f]  ;;  %v25_v4 = vld [vmem:[%s351_s0 + $0x20] sm:$0x7f]  ;;  %v26_v5 = vld [vmem:[%s351_s0 + $0x28] sm:$0x7f] }
   0x3   :  { %v198_v6 = vld [vmem:[%s352_s1] ss:$0 sm:$0xff]  ;;  %v27_v7 = vld [vmem:[%s351_s0 + $0x30] sm:$0x7f]  ;;  %v28_v8 = vld [vmem:[%s351_s0 + $0x38] sm:$0x7f] }
   0x4   :  { %v29_v9 = vld [vmem:[%s351_s0 + $0x40] sm:$0x7f]  ;;  %v30_v10 = vld [vmem:[%s351_s0 + $0x48] sm:$0x7f]  ;;  %v31_v11 = vld [vmem:[%s351_s0 + $0x50] sm:$0x7f]  ;;  %v39_v12 = vmul.f32 %v198_v6, %v21_v0  ;;  %v40_v17 = vmul.f32 %v198_v6, %v22_v1  ;;  %v41_v18 = vmul.f32 %v198_v6, %v23_v2  ;;  %v42_v19 = vmul.f32 %v198_v6, %v24_v3 }
   0x5   :  { %v199_v13 = vld [vmem:[%s353_s2] ss:$0 sm:$0xff]  ;;  %v32_v14 = vld [vmem:[%s351_s0 + $0x58] sm:$0x7f]  ;;  %v34_v16 = vld [vmem:[%s351_s0 + $0x68] sm:$0x7f]  ;;  %v43_v20 = vmul.f32 %v198_v6, %v25_v4  ;;  %v44_v21 = vmul.f32 %v198_v6, %v26_v5  ;;  %v45_v22 = vmul.f32 %v198_v6, %v27_v7  ;;  %v46_v23 = vmul.f32 %v198_v6, %v28_v8 }
   0x6   :  { %v33_v15 = vld [vmem:[%s351_s0 + $0x60] sm:$0x7f]  ;;  %v47_v24 = vmul.f32 %v198_v6, %v29_v9  ;;  %v48_v25 = vmul.f32 %v198_v6, %v30_v10  ;;  %v49_v26 = vmul.f32 %v198_v6, %v31_v11  ;;  %v50_v27 = vmul.f32 %v198_v6, %v32_v14  ;;  %v114_v53 = vld [vmem:[%s354_s3 + $0x8] sm:$0x7f]  ;;  %v115_v60 = vld [vmem:[%s354_s3 + $0x10] sm:$0x7f] }
   0x7   :  { %v51_v28 = vmul.f32 %v198_v6, %v33_v15  ;;  %v52_v29 = vmul.f32 %v198_v6, %v34_v16  ;;  %v57_v30 = vadd.f32 %v199_v13, %v39_v12  ;;  %v58_v31 = vadd.f32 %v199_v13, %v40_v17  ;;  %v113_v49 = vld [vmem:[%s354_s3] sm:$0x7f]  ;;  %v116_v1 = vld [vmem:[%s354_s3 + $0x18] sm:$0x7f]  ;;  %v118_v12 = vld [vmem:[%s354_s3 + $0x28] sm:$0x7f] }
   0x8   :  { %v59_v32 = vadd.f32 %v199_v13, %v41_v18  ;;  %v60_v33 = vadd.f32 %v199_v13, %v42_v19  ;;  %v61_v34 = vadd.f32 %v199_v13, %v43_v20  ;;  %v62_v35 = vadd.f32 %v199_v13, %v44_v21  ;;  %v117_v5 = vld [vmem:[%s354_s3 + $0x20] sm:$0x7f] }
   0x9   :  { %v63_v36 = vadd.f32 %v199_v13, %v45_v22  ;;  %v64_v37 = vadd.f32 %v199_v13, %v46_v23  ;;  %v65_v38 = vadd.f32 %v199_v13, %v47_v24  ;;  %v66_v39 = vadd.f32 %v199_v13, %v48_v25  ;;  %v119_v25 = vld [vmem:[%s354_s3 + $0x30] sm:$0x7f] }
   0xa   :  { %v67_v40 = vadd.f32 %v199_v13, %v49_v26  ;;  %v68_v41 = vadd.f32 %v199_v13, %v50_v27  ;;  %v282_v42 = vadd.f32 %v199_v13, %v51_v28  ;;  %v284_v43 = vadd.f32 %v199_v13, %v52_v29 }
   0xb   :  { %vm71_vm0 = vcmp.gt.f32.partialorder %v57_v30, 0.0  ;;  %vm72_vm1 = vcmp.gt.f32.partialorder %v58_v31, 0.0  ;;  %vm73_vm2 = vcmp.gt.f32.partialorder %v59_v32, 0.0  ;;  %vm74_vm3 = vcmp.gt.f32.partialorder %v60_v33, 0.0 }
   0xc   :  { %vm75_vm4 = vcmp.gt.f32.partialorder %v61_v34, 0.0  ;;  %vm76_vm5 = vcmp.gt.f32.partialorder %v62_v35, 0.0  ;;  %vm77_vm6 = vcmp.gt.f32.partialorder %v63_v36, 0.0  ;;  %vm78_vm7 = vcmp.gt.f32.partialorder %v64_v37, 0.0 }
   0xd   :  { %v85_v44 = vmul.f32 0.2, %v57_v30  ;;  %vm79_vm9 = vcmp.gt.f32.partialorder %v65_v38, 0.0  ;;  %vm80_vm10 = vcmp.gt.f32.partialorder %v66_v39, 0.0  ;;  %v86_v45 = vmul.f32 0.2, %v58_v31 }
   0xe   :  { %v87_v46 = vmul.f32 0.2, %v59_v32  ;;  %vm81_vm11 = vcmp.gt.f32.partialorder %v67_v40, 0.0  ;;  %vm82_vm12 = vcmp.gt.f32.partialorder %v68_v41, 0.0  ;;  %v88_v47 = vmul.f32 0.2, %v60_v33 }
   0xf   :  { %v92_v48 = vmul.f32 0.2, %v64_v37  ;;  %v89_v50 = vmul.f32 0.2, %v61_v34  ;;  %v93_v51 = vmul.f32 0.2, %v65_v38  ;;  %v99_v56 = vsel %vm71_vm0, %v57_v30, %v85_v44 }
  0x10   :  { %v94_v52 = vmul.f32 0.2, %v66_v39  ;;  %vm83_vm13 = vcmp.gt.f32.partialorder %v282_v42, 0.0  ;;  %v90_v54 = vmul.f32 0.2, %v62_v35  ;;  %vm84_vm14 = vcmp.gt.f32.partialorder %v284_v43, 0.0 }
  0x11   :  { %v95_v55 = vmul.f32 0.2, %v67_v40  ;;  %v96_v57 = vmul.f32 0.2, %v68_v41  ;;  %v100_v58 = vsel %vm72_vm1, %v58_v31, %v86_v45  ;;  %v101_v59 = vsel %vm73_vm2, %v59_v32, %v87_v46 }
  0x12   :  { %v91_v61 = vmul.f32 0.2, %v63_v36  ;;  %v102_v62 = vsel %vm74_vm3, %v60_v33, %v88_v47  ;;  %v106_v63 = vsel %vm78_vm7, %v64_v37, %v92_v48  ;;  %v107_v0 = vsel %vm79_vm9, %v65_v38, %v93_v51 }
  0x13   :  { %v97_v2 = vmul.f32 0.2, %v282_v42  ;;  %v103_v3 = vsel %vm75_vm4, %v61_v34, %v89_v50  ;;  %v108_v4 = vsel %vm80_vm10, %v66_v39, %v94_v52  ;;  %v120_v6 = vmul.f32 %v113_v49, %v99_v56 }
  0x14   :  { %v104_v7 = vsel %vm76_vm5, %v62_v35, %v90_v54  ;;  %v109_v8 = vsel %vm81_vm11, %v67_v40, %v95_v55  ;;  %v121_v9 = vmul.f32 %v114_v53, %v100_v58  ;;  %v122_v10 = vmul.f32 %v115_v60, %v101_v59 }
  0x15   :  { %v110_v11 = vsel %vm82_vm12, %v68_v41, %v96_v57  ;;  %v123_v13 = vmul.f32 %v116_v1, %v102_v62  ;;  %v127_v14 = vmul.f32 %v113_v49, %v106_v63  ;;  %v128_v15 = vmul.f32 %v114_v53, %v107_v0 }
  0x16   :  { %v98_v16 = vmul.f32 0.2, %v284_v43  ;;  %v105_v17 = vsel %vm77_vm6, %v63_v36, %v91_v61  ;;  %v124_v18 = vmul.f32 %v117_v5, %v103_v3  ;;  %v129_v19 = vmul.f32 %v115_v60, %v108_v4 }
  0x17   :  { %v130_v20 = vmul.f32 %v116_v1, %v109_v8  ;;  %v135_v21 = vsel %vm134_vm8, %v120_v6, 0.0  ;;  %v136_v22 = vsel %vm134_vm8, %v121_v9, 0.0  ;;  %v138_v23 = vsel %vm134_vm8, %v122_v10, 0.0 }
  0x18   :  { %v111_v24 = vsel %vm83_vm13, %v282_v42, %v97_v2  ;;  %v125_v26 = vmul.f32 %v118_v12, %v104_v7  ;;  %v131_v27 = vmul.f32 %v117_v5, %v110_v11  ;;  %v137_v28 = vadd.f32 %v136_v22, %v135_v21 }
  0x19   :  { %v140_v29 = vsel %vm134_vm8, %v123_v13, 0.0  ;;  %v148_v30 = vsel %vm134_vm8, %v127_v14, 0.0  ;;  %v149_v31 = vsel %vm134_vm8, %v128_v15, 0.0  ;;  %v151_v32 = vsel %vm134_vm8, %v129_v19, 0.0 }
  0x1a   :  { %v112_v33 = vsel %vm84_vm14, %v284_v43, %v98_v16  ;;  %v139_v34 = vadd.f32 %v138_v23, %v137_v28  ;;  %v150_v35 = vadd.f32 %v149_v31, %v148_v30  ;;  %v126_v36 = vmul.f32 %v119_v25, %v105_v17 }
  0x1b   :  { %v132_v37 = vmul.f32 %v118_v12, %v111_v24  ;;  %v142_v38 = vsel %vm134_vm8, %v124_v18, 0.0  ;;  %v153_v39 = vsel %vm134_vm8, %v130_v20, 0.0  ;;  %v133_v42 = vmul.f32 %v119_v25, %v112_v33 }
  0x1c   :  { %v141_v40 = vadd.f32 %v140_v29, %v139_v34  ;;  %v152_v41 = vadd.f32 %v151_v32, %v150_v35  ;;  %v144_v44 = vsel %vm134_vm8, %v125_v26, 0.0  ;;  %v155_v45 = vsel %vm134_vm8, %v131_v27, 0.0 }
  0x1d   :  { %v146_v48 = vsel %vm134_vm8, %v126_v36, 0.0  ;;  %v157_v43 = vsel %vm134_vm8, %v132_v37, 0.0  ;;  %v159_v51 = vsel %vm134_vm8, %v133_v42, 0.0  ;;  %vm180_vm0 = vcmask 517120  }
  0x1e   :  { %v143_v46 = vadd.f32 %v142_v38, %v141_v40  ;;  %v154_v47 = vadd.f32 %v153_v39, %v152_v41  ;;  %v185_v7 = vstv %s355_s4  ;;  %vm192_vm1 = vcmask 1024  }
  0x20   :  { %v145_v49 = vadd.f32 %v144_v44, %v143_v46  ;;  %v156_v50 = vadd.f32 %v155_v45, %v154_v47 }
  0x22   :  { %v147_v52 = vadd.f32 %v146_v48, %v145_v49  ;;  %v158_v53 = vadd.f32 %v157_v43, %v156_v50 }
  0x24   :  { %v160_v54 = vadd.f32 %v159_v51, %v158_v53  ;;  %v161_v55 = vsel %vm134_vm8, %v147_v52, 0.0 }
  0x25   :  { %v162_v56 = vrot.slane %v161_v55, 4 }
  0x26   :  { %v168_v57 = vsel %vm134_vm8, %v160_v54, 0.0 }
  0x27   :  { %v163_v58 = vadd.f32 %v162_v56, %v161_v55  ;;  %v169_v59 = vrot.slane %v168_v57, 4 }
  0x29   :  { %v164_v60 = vrot.slane %v163_v58, 2  ;;  %v170_v61 = vadd.f32 %v169_v59, %v168_v57 }
  0x2b   :  { %v165_v62 = vadd.f32 %v164_v60, %v163_v58  ;;  %v171_v63 = vrot.slane %v170_v61, 2 }
  0x2d   :  { %v166_v0 = vrot.slane %v165_v62, 1  ;;  %v172_v1 = vadd.f32 %v171_v63, %v170_v61 }
  0x2f   :  { %v167_v2 = vadd.f32 %v166_v0, %v165_v62  ;;  %v173_v3 = vrot.slane %v172_v1, 1 }
  0x31   :  { %v174_v4 = vadd.f32 %v173_v3, %v172_v1 }
  0x33   :  { %v178_v5 = vsel %vm177_vm15, %v174_v4, %v167_v2 }
  0x34   :  { %v181_v6 = vsel %vm180_vm0, %v178_v5, 0.0 }
  0x35   :  { %182 = vadd.xlane.f32.xlu0 %v181_v6 }
  0xa8   :  { %v183_v8 = vpop.xlane.xlu0 %182 }
  0xa9   :  { %v186_v9 = vadd.f32 %v185_v7, %v183_v8 }
  0xab   :  { %v187_v10 = vsub.f32 0.0, %v186_v9 }
  0xad   :  { %v188_v11 = vmul.f32 1.442695, %v187_v10 }
  0xaf   :  { %200 = vpow2.f32 %v188_v11 }
  0xb5   :  { %v201_v12 = vpop.eup %200 }
  0xb6   :  { %v190_v13 = vadd.f32 1.0, %v201_v12 }
  0xb8   :  { %202 = vrcp.f32 %v190_v13 }
  0xbe   :  { %v203_v14 = vpop.eup %202 }
  0xbf   :  { %193 = vst.msk [vmem:[%s356_s5] sm:$0x3] %vm192_vm1, %v203_v14 }

// kernel: discriminator_forward.2
= control target key start
LH: loop header
LB: loop body
LE: loop exit
PB: predicated region body
PF: predicated region fallthrough
CT: control target
= control target key end

     0   :  { %vm40_vm0 = vcmask 523264   ;;  %s1310_s1 = inlined_call_operand.vmem [shape: f32[64,128], index: 1, kind: input, shape index: {}]   ;;  %s1311_s0 = inlined_call_operand.vmem [shape: f32[2,64,64], index: 0, kind: input, shape index: {}]   ;;  %s1312_s2 = inlined_call_operand.vmem [shape: f32[4,128,64], index: 2, kind: input, shape index: {}]   ;;  %s1313_s3 = inlined_call_operand.vmem [shape: f32[2,7,7,64], index: 3, kind: output, shape index: {0}]   ;;  %s1314_s4 = inlined_call_operand.vmem [shape: f32[1,2,64], index: 4, kind: output, shape index: {1}]  }
   0x1   :  { %v39_v0 = vld [vmem:[%s1310_s1 + $0x38] sm:$0xff]  ;;  %v38_v1 = vld [vmem:[%s1310_s1 + $0x30] sm:$0xff]  ;;  %v37_v2 = vld [vmem:[%s1310_s1 + $0x28] sm:$0xff] }
   0x2   :  { %97 = vmatpush.msra.mxu0 %v39_v0  ;;  %833 = vmatpush.msra.mxu1 %v39_v0  ;;  %v36_v3 = vld [vmem:[%s1310_s1 + $0x20] sm:$0xff]  ;;  %v35_v4 = vld [vmem:[%s1310_s1 + $0x18] sm:$0xff]  ;;  %v34_v5 = vld [vmem:[%s1310_s1 + $0x10] sm:$0xff] }
   0x3   :  { %834 = vmatpush.msra.mxu2 %v39_v0  ;;  %835 = vmatpush.msra.mxu3 %v39_v0  ;;  %v33_v6 = vld [vmem:[%s1310_s1 + $0x8] sm:$0xff]  ;;  %v32_v7 = vld [vmem:[%s1310_s1] sm:$0xff]  ;;  %v26_v10 = vld [vmem:[%s1311_s0 + $0x50] sm:$0xff] }
   0x4   :  { %98 = vmatpush.msra.mxu0 %v38_v1  ;;  %836 = vmatpush.msra.mxu1 %v38_v1  ;;  %v16_v8 = vld [vmem:[%s1311_s0] sm:$0xff]  ;;  %v21_v9 = vld [vmem:[%s1311_s0 + $0x28] sm:$0xff]  ;;  %v832_v11 = vld [vmem:[%s1312_s2 + $0x1f8] sm:$0xff] }
   0x5   :  { %837 = vmatpush.msra.mxu2 %v38_v1  ;;  %838 = vmatpush.msra.mxu3 %v38_v1  ;;  %v17_v12 = vld [vmem:[%s1311_s0 + $0x8] sm:$0xff]  ;;  %v217_v13 = vld [vmem:[%s1312_s2 + $0x78] sm:$0xff]  ;;  %v831_v16 = vld [vmem:[%s1312_s2 + $0x1f0] sm:$0xff] }
   0x6   :  { %99 = vmatpush.msra.mxu0 %v37_v2  ;;  %839 = vmatpush.msra.mxu1 %v37_v2  ;;  %v800_v14 = vld [vmem:[%s1312_s2 + $0xf8] sm:$0xff]  ;;  %v216_v17 = vld [vmem:[%s1312_s2 + $0x70] sm:$0xff]  ;;  %v830_v20 = vld [vmem:[%s1312_s2 + $0x1e8] sm:$0xff] }
   0x7   :  { %840 = vmatpush.msra.mxu2 %v37_v2  ;;  %841 = vmatpush.msra.mxu3 %v37_v2  ;;  %v816_v15 = vld [vmem:[%s1312_s2 + $0x178] sm:$0xff]  ;;  %v799_v18 = vld [vmem:[%s1312_s2 + $0xf0] sm:$0xff]  ;;  %v215_v22 = vld [vmem:[%s1312_s2 + $0x68] sm:$0xff] }
   0x8   :  { %100 = vmatpush.msra.mxu0 %v36_v3  ;;  %842 = vmatpush.msra.mxu1 %v36_v3  ;;  %v815_v19 = vld [vmem:[%s1312_s2 + $0x170] sm:$0xff]  ;;  %v798_v23 = vld [vmem:[%s1312_s2 + $0xe8] sm:$0xff]  ;;  %v27_v24 = vld [vmem:[%s1311_s0 + $0x58] sm:$0xff] }
   0x9   :  { %843 = vmatpush.msra.mxu2 %v36_v3  ;;  %844 = vmatpush.msra.mxu3 %v36_v3  ;;  %v22_v21 = vld [vmem:[%s1311_s0 + $0x30] sm:$0xff]  ;;  %v814_v25 = vld [vmem:[%s1312_s2 + $0x168] sm:$0xff]  ;;  %v829_v26 = vld [vmem:[%s1312_s2 + $0x1e0] sm:$0xff] }
   0xa   :  { %101 = vmatpush.msra.mxu0 %v35_v4  ;;  %845 = vmatpush.msra.mxu1 %v35_v4  ;;  %v30_v27 = vld [vmem:[%s1311_s0 + $0x70] sm:$0xff]  ;;  %v214_v28 = vld [vmem:[%s1312_s2 + $0x60] sm:$0xff]  ;;  %v828_v31 = vld [vmem:[%s1312_s2 + $0x1d8] sm:$0xff] }
   0xb   :  { %846 = vmatpush.msra.mxu2 %v35_v4  ;;  %847 = vmatpush.msra.mxu3 %v35_v4  ;;  %v797_v29 = vld [vmem:[%s1312_s2 + $0xe0] sm:$0xff]  ;;  %v213_v32 = vld [vmem:[%s1312_s2 + $0x58] sm:$0xff]  ;;  %v827_v35 = vld [vmem:[%s1312_s2 + $0x1d0] sm:$0xff] }
   0xc   :  { %102 = vmatpush.msra.mxu0 %v34_v5  ;;  %848 = vmatpush.msra.mxu1 %v34_v5  ;;  %v813_v30 = vld [vmem:[%s1312_s2 + $0x160] sm:$0xff]  ;;  %v796_v33 = vld [vmem:[%s1312_s2 + $0xd8] sm:$0xff]  ;;  %v18_v36 = vld [vmem:[%s1311_s0 + $0x10] sm:$0xff] }
   0xd   :  { %849 = vmatpush.msra.mxu2 %v34_v5  ;;  %850 = vmatpush.msra.mxu3 %v34_v5  ;;  %v812_v34 = vld [vmem:[%s1312_s2 + $0x158] sm:$0xff]  ;;  %v212_v37 = vld [vmem:[%s1312_s2 + $0x50] sm:$0xff]  ;;  %v28_v40 = vld [vmem:[%s1311_s0 + $0x60] sm:$0xff] }
   0xe   :  { %103 = vmatpush.msra.mxu0 %v33_v6  ;;  %851 = vmatpush.msra.mxu1 %v33_v6  ;;  %v23_v38 = vld [vmem:[%s1311_s0 + $0x38] sm:$0xff]  ;;  %v795_v39 = vld [vmem:[%s1312_s2 + $0xd0] sm:$0xff]  ;;  %v211_v42 = vld [vmem:[%s1312_s2 + $0x48] sm:$0xff] }
   0xf   :  { %852 = vmatpush.msra.mxu2 %v33_v6  ;;  %853 = vmatpush.msra.mxu3 %v33_v6  ;;  %v811_v41 = vld [vmem:[%s1312_s2 + $0x150] sm:$0xff]  ;;  %v794_v43 = vld [vmem:[%s1312_s2 + $0xc8] sm:$0xff]  ;;  %v31_v46 = vld [vmem:[%s1311_s0 + $0x78] sm:$0xff] }
  0x10   :  { %104 = vmatpush.msra.mxu0 %v32_v7  ;;  %854 = vmatpush.msra.mxu1 %v32_v7  ;;  %v810_v44 = vld [vmem:[%s1312_s2 + $0x148] sm:$0xff]  ;;  %v210_v47 = vld [vmem:[%s1312_s2 + $0x40] sm:$0xff]  ;;  %v209_v51 = vld [vmem:[%s1312_s2 + $0x38] sm:$0xff] }
  0x11   :  { %769 = vmatmul.msk.f32.vlgmr.msra.gmra.mxu0 %vm40_vm0, %v16_v8  ;;  %855 = vmatpush.msra.mxu2 %v32_v7  ;;  %v826_v45 = vld [vmem:[%s1312_s2 + $0x1c8] sm:$0xff]  ;;  %v793_v48 = vld [vmem:[%s1312_s2 + $0xc0] sm:$0xff]  ;;  %v19_v52 = vld [vmem:[%s1311_s0 + $0x18] sm:$0xff] }
  0x12   :  { %774 = vmatmul.msk.f32.vlgmr.msra.gmra.mxu1 %vm40_vm0, %v21_v9  ;;  %856 = vmatpush.msra.mxu3 %v32_v7  ;;  %v809_v49 = vld [vmem:[%s1312_s2 + $0x140] sm:$0xff]  ;;  %v792_v53 = vld [vmem:[%s1312_s2 + $0xb8] sm:$0xff]  ;;  %v29_v56 = vld [vmem:[%s1311_s0 + $0x68] sm:$0xff] }
  0x13   :  { %779 = vmatmul.msk.f32.vlgmr.msra.gmra.mxu2 %vm40_vm0, %v26_v10  ;;  %528 = vmatpush.msrb.mxu0 %v832_v11  ;;  %v825_v50 = vld [vmem:[%s1312_s2 + $0x1c0] sm:$0xff]  ;;  %v808_v55 = vld [vmem:[%s1312_s2 + $0x138] sm:$0xff]  ;;  %v208_v58 = vld [vmem:[%s1312_s2 + $0x30] sm:$0xff] }
  0x14   :  { %218 = vmatpush.msrb.mxu1 %v217_v13  ;;  %298 = vmatpush.msrb.mxu2 %v800_v14  ;;  %v24_v54 = vld [vmem:[%s1311_s0 + $0x40] sm:$0xff]  ;;  %v824_v57 = vld [vmem:[%s1312_s2 + $0x1b8] sm:$0xff]  ;;  %v791_v59 = vld [vmem:[%s1312_s2 + $0xb0] sm:$0xff] }
  0x15   :  { %434 = vmatpush.msrb.mxu3 %v816_v15  ;;  %529 = vmatpush.msrb.mxu0 %v831_v16  ;;  %v807_v60 = vld [vmem:[%s1312_s2 + $0x130] sm:$0xff]  ;;  %v207_v62 = vld [vmem:[%s1312_s2 + $0x28] sm:$0xff]  ;;  %v206_v2 = vld [vmem:[%s1312_s2 + $0x20] sm:$0xff] }
  0x16   :  { %219 = vmatpush.msrb.mxu1 %v216_v17  ;;  %299 = vmatpush.msrb.mxu2 %v799_v18  ;;  %v823_v61 = vld [vmem:[%s1312_s2 + $0x1b0] sm:$0xff]  ;;  %v790_v63 = vld [vmem:[%s1312_s2 + $0xa8] sm:$0xff]  ;;  %v789_v3 = vld [vmem:[%s1312_s2 + $0xa0] sm:$0xff] }
  0x17   :  { %435 = vmatpush.msrb.mxu3 %v815_v19  ;;  %530 = vmatpush.msrb.mxu0 %v830_v20  ;;  %v806_v0 = vld [vmem:[%s1312_s2 + $0x128] sm:$0xff]  ;;  %v20_v4 = vld [vmem:[%s1311_s0 + $0x20] sm:$0xff]  ;;  %v205_v8 = vld [vmem:[%s1312_s2 + $0x18] sm:$0xff] }
  0x18   :  { %220 = vmatpush.msrb.mxu1 %v215_v22  ;;  %300 = vmatpush.msrb.mxu2 %v798_v23  ;;  %v822_v1 = vld [vmem:[%s1312_s2 + $0x1a8] sm:$0xff]  ;;  %v805_v5 = vld [vmem:[%s1312_s2 + $0x120] sm:$0xff]  ;;  %v788_v9 = vld [vmem:[%s1312_s2 + $0x98] sm:$0xff] }
  0x19   :  { %770 = vmatmul.msk.f32.gmra.mxu0 %vm40_vm0, %v17_v12  ;;  %436 = vmatpush.msrb.mxu3 %v814_v25  ;;  %v25_v6 = vld [vmem:[%s1311_s0 + $0x48] sm:$0xff]  ;;  %v821_v7 = vld [vmem:[%s1312_s2 + $0x1a0] sm:$0xff]  ;;  %v804_v10 = vld [vmem:[%s1312_s2 + $0x118] sm:$0xff] }
  0x1a   :  { %775 = vmatmul.msk.f32.gmra.mxu1 %vm40_vm0, %v22_v21  ;;  %531 = vmatpush.msrb.mxu0 %v829_v26  ;;  %v820_v11 = vld [vmem:[%s1312_s2 + $0x198] sm:$0xff]  ;;  %v204_v12 = vld [vmem:[%s1312_s2 + $0x10] sm:$0xff]  ;;  %v203_v16 = vld [vmem:[%s1312_s2 + $0x8] sm:$0xff] }
  0x1b   :  { %780 = vmatmul.msk.f32.gmra.mxu2 %vm40_vm0, %v27_v24  ;;  %783 = vmatmul.msk.f32.vlgmr.msra.gmra.mxu3 %vm40_vm0, %v30_v27  ;;  %v787_v13 = vld [vmem:[%s1312_s2 + $0x90] sm:$0xff]  ;;  %v786_v17 = vld [vmem:[%s1312_s2 + $0x88] sm:$0xff]  ;;  %v202_v20 = vld [vmem:[%s1312_s2] sm:$0xff] }
  0x1c   :  { %221 = vmatpush.msrb.mxu1 %v214_v28  ;;  %301 = vmatpush.msrb.mxu2 %v797_v29  ;;  %v803_v14 = vld [vmem:[%s1312_s2 + $0x110] sm:$0xff]  ;;  %v802_v18 = vld [vmem:[%s1312_s2 + $0x108] sm:$0xff]  ;;  %v785_v21 = vld [vmem:[%s1312_s2 + $0x80] sm:$0xff] }
  0x1d   :  { %437 = vmatpush.msrb.mxu3 %v813_v30  ;;  %532 = vmatpush.msrb.mxu0 %v828_v31  ;;  %v819_v15 = vld [vmem:[%s1312_s2 + $0x190] sm:$0xff]  ;;  %v818_v19 = vld [vmem:[%s1312_s2 + $0x188] sm:$0xff]  ;;  %v801_v22 = vld [vmem:[%s1312_s2 + $0x100] sm:$0xff] }
  0x1e   :  { %222 = vmatpush.msrb.mxu1 %v213_v32  ;;  %302 = vmatpush.msrb.mxu2 %v796_v33  ;;  %v817_v23 = vld [vmem:[%s1312_s2 + $0x180] sm:$0xff] }
  0x1f   :  { %438 = vmatpush.msrb.mxu3 %v812_v34  ;;  %533 = vmatpush.msrb.mxu0 %v827_v35 }
  0x20   :  { %223 = vmatpush.msrb.mxu1 %v212_v37  ;;  %303 = vmatpush.msrb.mxu2 %v795_v39 }
  0x21   :  { %771 = vmatmul.msk.f32.gmra.mxu0 %vm40_vm0, %v18_v36  ;;  %439 = vmatpush.msrb.mxu3 %v811_v41 }
  0x22   :  { %776 = vmatmul.msk.f32.gmra.mxu1 %vm40_vm0, %v23_v38  ;;  %304 = vmatpush.msrb.mxu2 %v794_v43 }
  0x23   :  { %781 = vmatmul.msk.f32.gmra.mxu2 %vm40_vm0, %v28_v40  ;;  %224 = vmatpush.msrb.mxu1 %v211_v42 }
  0x24   :  { %440 = vmatpush.msrb.mxu3 %v810_v44  ;;  %534 = vmatpush.msrb.mxu0 %v826_v45 }
  0x25   :  { %784 = vmatmul.msk.f32.gmra.mxu3 %vm40_vm0, %v31_v46  ;;  %225 = vmatpush.msrb.mxu1 %v210_v47 }
  0x26   :  { %305 = vmatpush.msrb.mxu2 %v793_v48  ;;  %441 = vmatpush.msrb.mxu3 %v809_v49 }
  0x27   :  { %535 = vmatpush.msrb.mxu0 %v825_v50  ;;  %226 = vmatpush.msrb.mxu1 %v209_v51 }
  0x28   :  { %306 = vmatpush.msrb.mxu2 %v792_v53  ;;  %442 = vmatpush.msrb.mxu3 %v808_v55 }
  0x29   :  { %772 = vmatmul.msk.f32.gmra.mxu0 %vm40_vm0, %v19_v52  ;;  %227 = vmatpush.msrb.mxu1 %v208_v58 }
  0x2a   :  { %777 = vmatmul.msk.f32.gmra.mxu1 %vm40_vm0, %v24_v54  ;;  %536 = vmatpush.msrb.mxu0 %v824_v57 }
  0x2b   :  { %782 = vmatmul.msk.f32.gmra.mxu2 %vm40_vm0, %v29_v56  ;;  %443 = vmatpush.msrb.mxu3 %v807_v60 }
  0x2c   :  { %307 = vmatpush.msrb.mxu2 %v791_v59  ;;  %537 = vmatpush.msrb.mxu0 %v823_v61 }
  0x2d   :  { %228 = vmatpush.msrb.mxu1 %v207_v62  ;;  %444 = vmatpush.msrb.mxu3 %v806_v0 }
  0x2e   :  { %308 = vmatpush.msrb.mxu2 %v790_v63  ;;  %538 = vmatpush.msrb.mxu0 %v822_v1 }
  0x2f   :  { %229 = vmatpush.msrb.mxu1 %v206_v2  ;;  %445 = vmatpush.msrb.mxu3 %v805_v5 }
  0x30   :  { %309 = vmatpush.msrb.mxu2 %v789_v3  ;;  %539 = vmatpush.msrb.mxu0 %v821_v7 }
  0x31   :  { %773 = vmatmul.msk.f32.gmra.mxu0 %vm40_vm0, %v20_v4  ;;  %230 = vmatpush.msrb.mxu1 %v205_v8 }
  0x32   :  { %778 = vmatmul.msk.f32.gmra.mxu1 %vm40_vm0, %v25_v6  ;;  %310 = vmatpush.msrb.mxu2 %v788_v9 }
  0x33   :  { %446 = vmatpush.msrb.mxu3 %v804_v10  ;;  %540 = vmatpush.msrb.mxu0 %v820_v11 }
  0x34   :  { %231 = vmatpush.msrb.mxu1 %v204_v12  ;;  %311 = vmatpush.msrb.mxu2 %v787_v13 }
  0x35   :  { %447 = vmatpush.msrb.mxu3 %v803_v14  ;;  %541 = vmatpush.msrb.mxu0 %v819_v15 }
  0x36   :  { %232 = vmatpush.msrb.mxu1 %v203_v16  ;;  %312 = vmatpush.msrb.mxu2 %v786_v17 }
  0x37   :  { %448 = vmatpush.msrb.mxu3 %v802_v18  ;;  %542 = vmatpush.msrb.mxu0 %v818_v19 }
  0x38   :  { %233 = vmatpush.msrb.mxu1 %v202_v20  ;;  %313 = vmatpush.msrb.mxu2 %v785_v21 }
  0x39   :  { %449 = vmatpush.msrb.mxu3 %v801_v22  ;;  %543 = vmatpush.msrb.mxu0 %v817_v23 }
  0x8e   :  { %v106_v24 = vpop.f32.mrf.mxu0 }
  0x8f   :  { %vm154_vm1 = vcmp.gt.f32.partialorder %v106_v24, 0.0  ;;  %v170_v25 = vmul.f32 0.2, %v106_v24  ;;  %v121_v36 = vpop.f32.mrf.mxu1 }
  0x90   :  { %v175_v41 = vmul.f32 0.2, %v121_v36  ;;  %vm159_vm6 = vcmp.gt.f32.partialorder %v121_v36, 0.0 }
  0x91   :  { %v186_v26 = vsel %vm154_vm1, %v106_v24, %v170_v25  ;;  %vm647_vm1 = vcmask 522240  }
  0x92   :  { %234 = vmatmul.f32.vlgmr.msrb.gmra.mxu1 %v186_v26  ;;  %314 = vmatmul.f32.vlgmr.msrb.gmra.mxu2 %v186_v26  ;;  %v191_v42 = vsel %vm159_vm6, %v121_v36, %v175_v41 }
  0x93   :  { %450 = vmatmul.f32.vlgmr.msrb.gmra.mxu3 %v186_v26  ;;  %544 = vmatmul.f32.vlgmr.msrb.gmra.mxu0 %v186_v26 }
  0x96   :  { %v109_v27 = vpop.f32.mrf.mxu0  ;;  %v136_v52 = vpop.f32.mrf.mxu2 }
  0x97   :  { %vm155_vm2 = vcmp.gt.f32.partialorder %v109_v27, 0.0  ;;  %v171_v28 = vmul.f32 0.2, %v109_v27  ;;  %v124_v40 = vpop.f32.mrf.mxu1  ;;  %v180_v55 = vmul.f32 0.2, %v136_v52  ;;  %vm164_vm11 = vcmp.gt.f32.partialorder %v136_v52, 0.0 }
  0x98   :  { %v176_v43 = vmul.f32 0.2, %v124_v40  ;;  %vm160_vm7 = vcmp.gt.f32.partialorder %v124_v40, 0.0 }
  0x99   :  { %v187_v29 = vsel %vm155_vm2, %v109_v27, %v171_v28  ;;  %v196_v57 = vsel %vm164_vm11, %v136_v52, %v180_v55  ;;  %vm703_vm2 = vcmask 516096  }
  0x9a   :  { %237 = vmatmul.f32.gmra.mxu1 %v187_v29  ;;  %317 = vmatmul.f32.gmra.mxu2 %v187_v29  ;;  %v192_v45 = vsel %vm160_vm7, %v124_v40, %v176_v43 }
  0x9b   :  { %452 = vmatmul.f32.gmra.mxu3 %v187_v29  ;;  %546 = vmatmul.f32.gmra.mxu0 %v187_v29 }
  0x9e   :  { %v112_v30 = vpop.f32.mrf.mxu0  ;;  %v139_v56 = vpop.f32.mrf.mxu2 }
  0x9f   :  { %vm156_vm3 = vcmp.gt.f32.partialorder %v112_v30, 0.0  ;;  %v172_v31 = vmul.f32 0.2, %v112_v30  ;;  %v127_v44 = vpop.f32.mrf.mxu1  ;;  %v181_v58 = vmul.f32 0.2, %v139_v56  ;;  %vm165_vm12 = vcmp.gt.f32.partialorder %v139_v56, 0.0  ;;  %v148_v1 = vpop.f32.mrf.mxu3 }
  0xa0   :  { %v177_v46 = vmul.f32 0.2, %v127_v44  ;;  %vm161_vm8 = vcmp.gt.f32.partialorder %v127_v44, 0.0  ;;  %v184_v3 = vmul.f32 0.2, %v148_v1  ;;  %vm168_vm15 = vcmp.gt.f32.partialorder %v148_v1, 0.0 }
  0xa1   :  { %v188_v32 = vsel %vm156_vm3, %v112_v30, %v172_v31  ;;  %v197_v60 = vsel %vm165_vm12, %v139_v56, %v181_v58 }
  0xa2   :  { %240 = vmatmul.f32.gmra.mxu1 %v188_v32  ;;  %320 = vmatmul.f32.gmra.mxu2 %v188_v32  ;;  %v193_v48 = vsel %vm161_vm8, %v127_v44, %v177_v46  ;;  %v200_v4 = vsel %vm168_vm15, %v148_v1, %v184_v3 }
  0xa3   :  { %455 = vmatmul.f32.gmra.mxu3 %v188_v32  ;;  %549 = vmatmul.f32.gmra.mxu0 %v188_v32 }
  0xa6   :  { %v115_v33 = vpop.f32.mrf.mxu0  ;;  %v142_v59 = vpop.f32.mrf.mxu2 }
  0xa7   :  { %vm157_vm4 = vcmp.gt.f32.partialorder %v115_v33, 0.0  ;;  %v173_v34 = vmul.f32 0.2, %v115_v33  ;;  %v130_v47 = vpop.f32.mrf.mxu1  ;;  %v182_v61 = vmul.f32 0.2, %v142_v59  ;;  %vm166_vm13 = vcmp.gt.f32.partialorder %v142_v59, 0.0 }
  0xa8   :  { %v178_v49 = vmul.f32 0.2, %v130_v47  ;;  %vm162_vm9 = vcmp.gt.f32.partialorder %v130_v47, 0.0  ;;  %v151_v5 = vpop.f32.mrf.mxu3 }
  0xa9   :  { %v189_v35 = vsel %vm157_vm4, %v115_v33, %v173_v34  ;;  %v198_v62 = vsel %vm166_vm13, %v142_v59, %v182_v61  ;;  %v185_v6 = vmul.f32 0.2, %v151_v5  ;;  %vm169_vm0 = vcmp.gt.f32.partialorder %v151_v5, 0.0 }
  0xaa   :  { %243 = vmatmul.f32.gmra.mxu1 %v189_v35  ;;  %323 = vmatmul.f32.gmra.mxu2 %v189_v35  ;;  %v194_v50 = vsel %vm162_vm9, %v130_v47, %v178_v49 }
  0xab   :  { %458 = vmatmul.f32.gmra.mxu3 %v189_v35  ;;  %552 = vmatmul.f32.gmra.mxu0 %v189_v35  ;;  %v201_v7 = vsel %vm169_vm0, %v151_v5, %v185_v6 }
  0xae   :  { %v118_v37 = vpop.f32.mrf.mxu0  ;;  %v145_v63 = vpop.f32.mrf.mxu2 }
  0xaf   :  { %vm158_vm5 = vcmp.gt.f32.partialorder %v118_v37, 0.0  ;;  %v174_v38 = vmul.f32 0.2, %v118_v37  ;;  %v133_v51 = vpop.f32.mrf.mxu1  ;;  %v183_v0 = vmul.f32 0.2, %v145_v63  ;;  %vm167_vm14 = vcmp.gt.f32.partialorder %v145_v63, 0.0 }
  0xb0   :  { %v179_v53 = vmul.f32 0.2, %v133_v51  ;;  %vm163_vm10 = vcmp.gt.f32.partialorder %v133_v51, 0.0 }
  0xb1   :  { %v190_v39 = vsel %vm158_vm5, %v118_v37, %v174_v38  ;;  %v199_v2 = vsel %vm167_vm14, %v145_v63, %v183_v0 }
  0xb2   :  { %246 = vmatmul.f32.gmra.mxu1 %v190_v39  ;;  %326 = vmatmul.f32.gmra.mxu2 %v190_v39  ;;  %v195_v54 = vsel %vm163_vm10, %v133_v51, %v179_v53 }
  0xb3   :  { %461 = vmatmul.f32.gmra.mxu3 %v190_v39  ;;  %555 = vmatmul.f32.gmra.mxu0 %v190_v39 }
  0xba   :  { %249 = vmatmul.f32.gmra.mxu1 %v191_v42  ;;  %329 = vmatmul.f32.gmra.mxu2 %v191_v42 }
  0xbb   :  { %464 = vmatmul.f32.gmra.mxu3 %v191_v42  ;;  %558 = vmatmul.f32.gmra.mxu0 %v191_v42 }
  0xc2   :  { %252 = vmatmul.f32.gmra.mxu1 %v192_v45  ;;  %332 = vmatmul.f32.gmra.mxu2 %v192_v45 }
  0xc3   :  { %467 = vmatmul.f32.gmra.mxu3 %v192_v45  ;;  %561 = vmatmul.f32.gmra.mxu0 %v192_v45 }
  0xca   :  { %255 = vmatmul.f32.gmra.mxu1 %v193_v48  ;;  %335 = vmatmul.f32.gmra.mxu2 %v193_v48 }
  0xcb   :  { %470 = vmatmul.f32.gmra.mxu3 %v193_v48  ;;  %564 = vmatmul.f32.gmra.mxu0 %v193_v48 }
  0xd2   :  { %257 = vmatmul.f32.gmra.mxu1 %v194_v50  ;;  %337 = vmatmul.f32.gmra.mxu2 %v194_v50 }
  0xd3   :  { %473 = vmatmul.f32.gmra.mxu3 %v194_v50  ;;  %567 = vmatmul.f32.gmra.mxu0 %v194_v50 }
  0xda   :  { %260 = vmatmul.f32.gmra.mxu1 %v195_v54  ;;  %340 = vmatmul.f32.gmra.mxu2 %v195_v54 }
  0xdb   :  { %475 = vmatmul.f32.gmra.mxu3 %v195_v54  ;;  %569 = vmatmul.f32.gmra.mxu0 %v195_v54 }
  0xe2   :  { %263 = vmatmul.f32.gmra.mxu1 %v196_v57  ;;  %343 = vmatmul.f32.gmra.mxu2 %v196_v57 }
  0xe3   :  { %478 = vmatmul.f32.gmra.mxu3 %v196_v57  ;;  %572 = vmatmul.f32.gmra.mxu0 %v196_v57 }
  0xea   :  { %266 = vmatmul.f32.gmra.mxu1 %v197_v60  ;;  %346 = vmatmul.f32.gmra.mxu2 %v197_v60 }
  0xeb   :  { %481 = vmatmul.f32.gmra.mxu3 %v197_v60  ;;  %575 = vmatmul.f32.gmra.mxu0 %v197_v60 }
  0xf2   :  { %269 = vmatmul.f32.gmra.mxu1 %v198_v62  ;;  %349 = vmatmul.f32.gmra.mxu2 %v198_v62 }
  0xf3   :  { %484 = vmatmul.f32.gmra.mxu3 %v198_v62  ;;  %578 = vmatmul.f32.gmra.mxu0 %v198_v62 }
  0xfa   :  { %272 = vmatmul.f32.gmra.mxu1 %v199_v2  ;;  %352 = vmatmul.f32.gmra.mxu2 %v199_v2 }
  0xfb   :  { %487 = vmatmul.f32.gmra.mxu3 %v199_v2  ;;  %581 = vmatmul.f32.gmra.mxu0 %v199_v2 }
 0x102   :  { %275 = vmatmul.f32.gmra.mxu1 %v200_v4  ;;  %355 = vmatmul.f32.gmra.mxu2 %v200_v4 }
 0x103   :  { %490 = vmatmul.f32.gmra.mxu3 %v200_v4  ;;  %584 = vmatmul.f32.gmra.mxu0 %v200_v4 }
 0x10a   :  { %278 = vmatmul.f32.gmra.mxu1 %v201_v7  ;;  %358 = vmatmul.f32.gmra.mxu2 %v201_v7 }
 0x10b   :  { %493 = vmatmul.f32.gmra.mxu3 %v201_v7  ;;  %587 = vmatmul.f32.gmra.mxu0 %v201_v7 }
 0x10f   :  { %v235_v8 = vpop.f32.mrf.mxu1 }
 0x110   :  { %v545_v9 = vpop.f32.mrf.mxu0 }
 0x115   :  { %v315_v10 = vpop.f32.mrf.mxu2 }
 0x116   :  { %v451_v11 = vpop.f32.mrf.mxu3  ;;  %v375_v14 = vrot.slane %v315_v10, 1 }
 0x117   :  { %v238_v12 = vpop.f32.mrf.mxu1 }
 0x118   :  { %v547_v13 = vpop.f32.mrf.mxu0  ;;  %v403_v16 = vadd.f32 %v375_v14, %v235_v8 }
 0x119   :  { %v605_v18 = vrot.slane %v547_v13, 1 }
 0x11d   :  { %v318_v15 = vpop.f32.mrf.mxu2 }
 0x11e   :  { %v453_v17 = vpop.f32.mrf.mxu3  ;;  %v376_v22 = vrot.slane %v318_v15, 1 }
 0x11f   :  { %v497_v19 = vadd.f32 %v453_v17, %v403_v16  ;;  %v241_v20 = vpop.f32.mrf.mxu1 }
 0x120   :  { %v550_v21 = vpop.f32.mrf.mxu0  ;;  %v404_v25 = vadd.f32 %v376_v22, %v238_v12 }
 0x121   :  { %v1162_v23 = vadd.f32 %v605_v18, %v497_v19  ;;  %v606_v27 = vrot.slane %v550_v21, 1 }
 0x123   :  { %648 = vst.msk [vmem:[%s1313_s3] sm:$0x7f] %vm647_vm1, %v1162_v23 }
 0x125   :  { %v321_v24 = vpop.f32.mrf.mxu2 }
 0x126   :  { %v456_v26 = vpop.f32.mrf.mxu3  ;;  %v377_v31 = vrot.slane %v321_v24, 1 }
 0x127   :  { %v498_v28 = vadd.f32 %v456_v26, %v404_v25  ;;  %v244_v29 = vpop.f32.mrf.mxu1 }
 0x128   :  { %v553_v30 = vpop.f32.mrf.mxu0  ;;  %v405_v34 = vadd.f32 %v377_v31, %v241_v20 }
 0x129   :  { %v1169_v32 = vadd.f32 %v606_v27, %v498_v28  ;;  %v607_v36 = vrot.slane %v553_v30, 1 }
 0x12b   :  { %649 = vst.msk [vmem:[%s1313_s3 + $0x8] sm:$0x7f] %vm647_vm1, %v1169_v32 }
 0x12d   :  { %v324_v33 = vpop.f32.mrf.mxu2 }
 0x12e   :  { %v459_v35 = vpop.f32.mrf.mxu3  ;;  %v378_v40 = vrot.slane %v324_v33, 1  ;;  %v705_v33 = vmul.f32 %v1162_v23, %v1162_v23 }
 0x12f   :  { %v499_v37 = vadd.f32 %v459_v35, %v405_v34  ;;  %v247_v38 = vpop.f32.mrf.mxu1 }
 0x130   :  { %v556_v39 = vpop.f32.mrf.mxu0  ;;  %v406_v43 = vadd.f32 %v378_v40, %v244_v29  ;;  %v706_v40 = vmul.f32 %v1169_v32, %v1169_v32 }
 0x131   :  { %v1176_v41 = vadd.f32 %v607_v36, %v499_v37  ;;  %v608_v45 = vrot.slane %v556_v39, 1 }
 0x133   :  { %650 = vst.msk [vmem:[%s1313_s3 + $0x10] sm:$0x7f] %vm647_vm1, %v1176_v41 }
 0x135   :  { %v327_v42 = vpop.f32.mrf.mxu2 }
 0x136   :  { %v462_v44 = vpop.f32.mrf.mxu3  ;;  %v379_v49 = vrot.slane %v327_v42, 1 }
 0x137   :  { %v500_v46 = vadd.f32 %v462_v44, %v406_v43  ;;  %v250_v47 = vpop.f32.mrf.mxu1 }
 0x138   :  { %v559_v48 = vpop.f32.mrf.mxu0  ;;  %v407_v52 = vadd.f32 %v379_v49, %v247_v38  ;;  %v662_v38 = vsel %vm647_vm1, %v1162_v23, 0.0 }
 0x139   :  { %v1183_v50 = vadd.f32 %v608_v45, %v500_v46  ;;  %v609_v54 = vrot.slane %v559_v48, 1  ;;  %v719_v46 = vsel %vm647_vm1, %v705_v33, 0.0 }
 0x13b   :  { %651 = vst.msk [vmem:[%s1313_s3 + $0x18] sm:$0x7f] %vm647_vm1, %v1183_v50 }
 0x13d   :  { %v330_v51 = vpop.f32.mrf.mxu2 }
 0x13e   :  { %v465_v53 = vpop.f32.mrf.mxu3  ;;  %v380_v58 = vrot.slane %v330_v51, 1 }
 0x13f   :  { %v501_v55 = vadd.f32 %v465_v53, %v407_v52  ;;  %v253_v56 = vpop.f32.mrf.mxu1  ;;  %v722_v52 = vsel %vm647_vm1, %v706_v40, 0.0 }
 0x140   :  { %v562_v57 = vpop.f32.mrf.mxu0  ;;  %v408_v61 = vadd.f32 %v380_v58, %v250_v47  ;;  %v665_v47 = vsel %vm647_vm1, %v1169_v32, 0.0 }
 0x141   :  { %v1190_v59 = vadd.f32 %v609_v54, %v501_v55  ;;  %v610_v63 = vrot.slane %v562_v57, 1 }
 0x143   :  { %652 = vst.msk [vmem:[%s1313_s3 + $0x20] sm:$0x7f] %vm647_vm1, %v1190_v59 }
 0x145   :  { %v333_v60 = vpop.f32.mrf.mxu2 }
 0x146   :  { %v468_v62 = vpop.f32.mrf.mxu3  ;;  %v381_v3 = vrot.slane %v333_v60, 1 }
 0x147   :  { %v502_v0 = vadd.f32 %v468_v62, %v408_v61  ;;  %v256_v1 = vpop.f32.mrf.mxu1 }
 0x148   :  { %v565_v2 = vpop.f32.mrf.mxu0  ;;  %v409_v6 = vadd.f32 %v381_v3, %v253_v56  ;;  %v707_v3 = vmul.f32 %v1176_v41, %v1176_v41 }
 0x149   :  { %v1197_v4 = vadd.f32 %v610_v63, %v502_v0  ;;  %v611_v8 = vrot.slane %v565_v2, 1 }
 0x14b   :  { %653 = vst.msk [vmem:[%s1313_s3 + $0x28] sm:$0x7f] %vm647_vm1, %v1197_v4 }
 0x14d   :  { %v336_v5 = vpop.f32.mrf.mxu2 }
 0x14e   :  { %v471_v7 = vpop.f32.mrf.mxu3 }
 0x14f   :  { %v503_v9 = vadd.f32 %v471_v7, %v409_v6  ;;  %v258_v10 = vpop.f32.mrf.mxu1 }
 0x150   :  { %v568_v11 = vpop.f32.mrf.mxu0 }
 0x151   :  { %v1204_v12 = vadd.f32 %v611_v8, %v503_v9  ;;  %v668_v8 = vsel %vm647_vm1, %v1176_v41, 0.0 }
 0x153   :  { %654 = vst.msk [vmem:[%s1313_s3 + $0x30] sm:$0x7f] %vm647_vm1, %v1204_v12 }
 0x155   :  { %v338_v13 = vpop.f32.mrf.mxu2 }
 0x156   :  { %v474_v14 = vpop.f32.mrf.mxu3  ;;  %v382_v17 = vrot.slane %v338_v13, 1  ;;  %v725_v13 = vsel %vm647_vm1, %v707_v3, 0.0  ;;  %v710_v3 = vmul.f32 %v1197_v4, %v1197_v4 }
 0x157   :  { %v261_v15 = vpop.f32.mrf.mxu1 }
 0x158   :  { %v570_v16 = vpop.f32.mrf.mxu0  ;;  %v410_v19 = vadd.f32 %v382_v17, %v258_v10 }
 0x159   :  { %v612_v21 = vrot.slane %v570_v16, 1 }
 0x15d   :  { %v341_v18 = vpop.f32.mrf.mxu2 }
 0x15e   :  { %v476_v20 = vpop.f32.mrf.mxu3  ;;  %v383_v26 = vrot.slane %v341_v18, 1 }
 0x15f   :  { %v504_v22 = vadd.f32 %v476_v20, %v410_v19  ;;  %v264_v24 = vpop.f32.mrf.mxu1 }
 0x160   :  { %v573_v25 = vpop.f32.mrf.mxu0  ;;  %v411_v30 = vadd.f32 %v383_v26, %v261_v15  ;;  %v708_v26 = vmul.f32 %v1183_v50, %v1183_v50 }
 0x161   :  { %v640_v27 = vadd.f32 %v612_v21, %v504_v22  ;;  %v613_v35 = vrot.slane %v573_v25, 1 }
 0x163   :  { %655 = vst.msk [vmem:[%s1313_s3 + $0x38] sm:$0x7f] %vm647_vm1, %v640_v27  ;;  %v712_v28 = vmul.f32 %v640_v27, %v640_v27  ;;  %v663_v34 = vsel %vm647_vm1, %v640_v27, 0.0 }
 0x164   :  { %v664_v45 = vadd.f32 %v663_v34, %v662_v38 }
 0x165   :  { %v344_v29 = vpop.f32.mrf.mxu2  ;;  %v720_v42 = vsel %vm647_vm1, %v712_v28, 0.0 }
 0x166   :  { %v479_v31 = vpop.f32.mrf.mxu3  ;;  %v384_v43 = vrot.slane %v344_v29, 1  ;;  %v721_v49 = vadd.f32 %v720_v42, %v719_v46  ;;  %v683_v56 = vsel %vm647_vm1, %v664_v45, 0.0 }
 0x167   :  { %v505_v36 = vadd.f32 %v479_v31, %v411_v30  ;;  %v267_v37 = vpop.f32.mrf.mxu1  ;;  %v671_v30 = vsel %vm647_vm1, %v1183_v50, 0.0 }
 0x168   :  { %v576_v39 = vpop.f32.mrf.mxu0  ;;  %v412_v55 = vadd.f32 %v384_v43, %v264_v24  ;;  %v740_v0 = vsel %vm647_vm1, %v721_v49, 0.0 }
 0x169   :  { %v641_v44 = vadd.f32 %v613_v35, %v505_v36  ;;  %v614_v61 = vrot.slane %v576_v39, 1  ;;  %v728_v35 = vsel %vm647_vm1, %v708_v26, 0.0 }
 0x16b   :  { %656 = vst.msk [vmem:[%s1313_s3 + $0x40] sm:$0x7f] %vm647_vm1, %v641_v44  ;;  %v666_v23 = vsel %vm647_vm1, %v641_v44, 0.0  ;;  %v713_v48 = vmul.f32 %v641_v44, %v641_v44 }
 0x16c   :  { %v667_v51 = vadd.f32 %v666_v23, %v665_v47  ;;  %v709_v47 = vmul.f32 %v1190_v59, %v1190_v59 }
 0x16d   :  { %v723_v53 = vsel %vm647_vm1, %v713_v48, 0.0  ;;  %v347_v54 = vpop.f32.mrf.mxu2 }
 0x16e   :  { %v684_v32 = vsel %vm647_vm1, %v667_v51, 0.0  ;;  %v724_v57 = vadd.f32 %v723_v53, %v722_v52  ;;  %v482_v58 = vpop.f32.mrf.mxu3  ;;  %v385_v6 = vrot.slane %v347_v54, 1  ;;  %v674_v52 = vsel %vm647_vm1, %v1190_v59, 0.0 }
 0x16f   :  { %v685_v60 = vadd.f32 %v684_v32, %v683_v56  ;;  %v506_v62 = vadd.f32 %v482_v58, %v412_v55  ;;  %v270_v63 = vpop.f32.mrf.mxu1  ;;  %v731_v56 = vsel %vm647_vm1, %v709_v47, 0.0 }
 0x170   :  { %v741_v1 = vsel %vm647_vm1, %v724_v57, 0.0  ;;  %v579_v2 = vpop.f32.mrf.mxu0  ;;  %v413_v16 = vadd.f32 %v385_v6, %v267_v37 }
 0x171   :  { %v742_v5 = vadd.f32 %v741_v1, %v740_v0  ;;  %v642_v7 = vadd.f32 %v614_v61, %v506_v62  ;;  %v615_v20 = vrot.slane %v579_v2, 1 }
 0x173   :  { %657 = vst.msk [vmem:[%s1313_s3 + $0x48] sm:$0x7f] %vm647_vm1, %v642_v7  ;;  %v669_v9 = vsel %vm647_vm1, %v642_v7, 0.0  ;;  %v714_v10 = vmul.f32 %v642_v7, %v642_v7 }
 0x174   :  { %v670_v11 = vadd.f32 %v669_v9, %v668_v8  ;;  %v677_v8 = vsel %vm647_vm1, %v1197_v4, 0.0 }
 0x175   :  { %v726_v14 = vsel %vm647_vm1, %v714_v10, 0.0  ;;  %v350_v15 = vpop.f32.mrf.mxu2 }
 0x176   :  { %v686_v17 = vsel %vm647_vm1, %v670_v11, 0.0  ;;  %v727_v18 = vadd.f32 %v726_v14, %v725_v13  ;;  %v485_v19 = vpop.f32.mrf.mxu3  ;;  %v386_v28 = vrot.slane %v350_v15, 1  ;;  %v734_v14 = vsel %vm647_vm1, %v710_v3, 0.0 }
 0x177   :  { %v687_v41 = vadd.f32 %v686_v17, %v685_v60  ;;  %v507_v21 = vadd.f32 %v485_v19, %v413_v16  ;;  %v273_v22 = vpop.f32.mrf.mxu1 }
 0x178   :  { %v743_v24 = vsel %vm647_vm1, %v727_v18, 0.0  ;;  %v582_v25 = vpop.f32.mrf.mxu0  ;;  %v414_v38 = vadd.f32 %v386_v28, %v270_v63 }
 0x179   :  { %v744_v27 = vadd.f32 %v743_v24, %v742_v5  ;;  %v643_v29 = vadd.f32 %v615_v20, %v507_v21  ;;  %v616_v43 = vrot.slane %v582_v25, 1  ;;  %v711_v24 = vmul.f32 %v1204_v12, %v1204_v12 }
 0x17b   :  { %658 = vst.msk [vmem:[%s1313_s3 + $0x50] sm:$0x7f] %vm647_vm1, %v643_v29  ;;  %v672_v31 = vsel %vm647_vm1, %v643_v29, 0.0  ;;  %v715_v33 = vmul.f32 %v643_v29, %v643_v29 }
 0x17c   :  { %v673_v34 = vadd.f32 %v672_v31, %v671_v30  ;;  %v737_v31 = vsel %vm647_vm1, %v711_v24, 0.0 }
 0x17d   :  { %v729_v36 = vsel %vm647_vm1, %v715_v33, 0.0  ;;  %v353_v37 = vpop.f32.mrf.mxu2 }
 0x17e   :  { %v688_v39 = vsel %vm647_vm1, %v673_v34, 0.0  ;;  %v730_v40 = vadd.f32 %v729_v36, %v728_v35  ;;  %v488_v42 = vpop.f32.mrf.mxu3  ;;  %v387_v48 = vrot.slane %v353_v37, 1 }
 0x17f   :  { %v689_v50 = vadd.f32 %v688_v39, %v687_v41  ;;  %v508_v44 = vadd.f32 %v488_v42, %v414_v38  ;;  %v276_v45 = vpop.f32.mrf.mxu1 }
 0x180   :  { %v745_v46 = vsel %vm647_vm1, %v730_v40, 0.0  ;;  %v585_v51 = vpop.f32.mrf.mxu0  ;;  %v415_v58 = vadd.f32 %v387_v48, %v273_v22 }
 0x181   :  { %v746_v23 = vadd.f32 %v745_v46, %v744_v27  ;;  %v644_v49 = vadd.f32 %v616_v43, %v508_v44  ;;  %v617_v63 = vrot.slane %v585_v51, 1  ;;  %v680_v27 = vsel %vm647_vm1, %v1204_v12, 0.0 }
 0x183   :  { %659 = vst.msk [vmem:[%s1313_s3 + $0x58] sm:$0x7f] %vm647_vm1, %v644_v49  ;;  %v675_v53 = vsel %vm647_vm1, %v644_v49, 0.0  ;;  %v716_v54 = vmul.f32 %v644_v49, %v644_v49 }
 0x184   :  { %v676_v55 = vadd.f32 %v675_v53, %v674_v52 }
 0x185   :  { %v732_v32 = vsel %vm647_vm1, %v716_v54, 0.0  ;;  %v356_v57 = vpop.f32.mrf.mxu2 }
 0x186   :  { %v690_v60 = vsel %vm647_vm1, %v676_v55, 0.0  ;;  %v733_v61 = vadd.f32 %v732_v32, %v731_v56  ;;  %v491_v62 = vpop.f32.mrf.mxu3  ;;  %v388_v6 = vrot.slane %v356_v57, 1 }
 0x187   :  { %v691_v59 = vadd.f32 %v690_v60, %v689_v50  ;;  %v509_v0 = vadd.f32 %v491_v62, %v415_v58  ;;  %v279_v1 = vpop.f32.mrf.mxu1 }
 0x188   :  { %v747_v2 = vsel %vm647_vm1, %v733_v61, 0.0  ;;  %v588_v13 = vpop.f32.mrf.mxu0  ;;  %v416_v17 = vadd.f32 %v388_v6, %v276_v45 }
 0x189   :  { %v748_v5 = vadd.f32 %v747_v2, %v746_v23  ;;  %v645_v7 = vadd.f32 %v617_v63, %v509_v0  ;;  %v618_v20 = vrot.slane %v588_v13, 1 }
 0x18b   :  { %660 = vst.msk [vmem:[%s1313_s3 + $0x60] sm:$0x7f] %vm647_vm1, %v645_v7  ;;  %v678_v9 = vsel %vm647_vm1, %v645_v7, 0.0  ;;  %v717_v10 = vmul.f32 %v645_v7, %v645_v7 }
 0x18c   :  { %v679_v11 = vadd.f32 %v678_v9, %v677_v8 }
 0x18d   :  { %v735_v15 = vsel %vm647_vm1, %v717_v10, 0.0  ;;  %v359_v16 = vpop.f32.mrf.mxu2 }
 0x18e   :  { %v692_v18 = vsel %vm647_vm1, %v679_v11, 0.0  ;;  %v736_v19 = vadd.f32 %v735_v15, %v734_v14  ;;  %v494_v4 = vpop.f32.mrf.mxu3 }
 0x18f   :  { %v693_v41 = vadd.f32 %v692_v18, %v691_v59  ;;  %v510_v21 = vadd.f32 %v494_v4, %v416_v17 }
 0x190   :  { %v749_v22 = vsel %vm647_vm1, %v736_v19, 0.0 }
 0x191   :  { %v750_v25 = vadd.f32 %v749_v22, %v748_v5  ;;  %v646_v26 = vadd.f32 %v618_v20, %v510_v21 }
 0x193   :  { %661 = vst.msk [vmem:[%s1313_s3 + $0x68] sm:$0x7f] %vm647_vm1, %v646_v26  ;;  %v681_v28 = vsel %vm647_vm1, %v646_v26, 0.0  ;;  %v718_v29 = vmul.f32 %v646_v26, %v646_v26 }
 0x194   :  { %v682_v30 = vadd.f32 %v681_v28, %v680_v27 }
 0x195   :  { %v738_v33 = vsel %vm647_vm1, %v718_v29, 0.0 }
 0x196   :  { %v694_v34 = vsel %vm647_vm1, %v682_v30, 0.0  ;;  %v739_v35 = vadd.f32 %v738_v33, %v737_v31 }
 0x197   :  { %v695_v36 = vadd.f32 %v694_v34, %v693_v41 }
 0x198   :  { %v751_v37 = vsel %vm647_vm1, %v739_v35, 0.0 }
 0x199   :  { %v696_v12 = vsel %vm647_vm1, %v695_v36, 0.0  ;;  %v752_v38 = vadd.f32 %v751_v37, %v750_v25 }
 0x19a   :  { %v697_v39 = vrot.slane %v696_v12, 4 }
 0x19b   :  { %v753_v40 = vsel %vm647_vm1, %v752_v38, 0.0 }
 0x19c   :  { %v698_v42 = vadd.f32 %v697_v39, %v696_v12  ;;  %v754_v50 = vrot.slane %v753_v40, 4 }
 0x19e   :  { %v699_v43 = vrot.slane %v698_v42, 2  ;;  %v755_v44 = vadd.f32 %v754_v50, %v753_v40 }
 0x1a0   :  { %v700_v45 = vadd.f32 %v699_v43, %v698_v42  ;;  %v756_v46 = vrot.slane %v755_v44, 2 }
 0x1a2   :  { %v701_v47 = vrot.slane %v700_v45, 1  ;;  %v757_v23 = vadd.f32 %v756_v46, %v755_v44 }
 0x1a4   :  { %v702_v48 = vadd.f32 %v701_v47, %v700_v45  ;;  %v758_v49 = vrot.slane %v757_v23, 1 }
 0x1a6   :  { %704 = vst.msk [vmem:[%s1314_s4] sm:$0x1] %vm703_vm2, %v702_v48  ;;  %v759_v51 = vadd.f32 %v758_v49, %v757_v23 }
 0x1a8   :  { %760 = vst.msk [vmem:[%s1314_s4 + $0x1] sm:$0x1] %vm703_vm2, %v759_v51 }

</bundles_post_ra>
